<compile_context>
chip_gen: v5e
topology: v5e:2x2
jax: 0.10.0
libtpu: 0.0.40
codegen_flags: <defaults>
</compile_context>

<pallas_src>
import functools
import math
from typing import Dict

import jax
import jax.numpy as jnp
from jax.experimental import pallas as pl
from jax.experimental.pallas import tpu as pltpu


def _create_points_kernel(chan_ref, expand_ref, rays_ref, dists_ref, out_ref):
    """chan_ref:   (1, 3*tn)  int32, lane j holds j % 3 (channel-id pattern)
       expand_ref: (tn, 3*tn) bf16 one-hot, expand[n, 3n+c] = 1
       rays_ref:   (tr, 6)    = [ox, oy, oz, dx, dy, dz]
       dists_ref:  (tr, tn)
       out_ref:    (tr, 3*tn) interleaved: out[r, 3n+c] = o_c + d_c * t[r, n]
    """
    f32 = jnp.float32
    expand = expand_ref[...]                      # (tn, 3tn) bf16 one-hot

    # ---- lane expand on the MXU: t3[r, 3n+c] = t[r, n] -------------------
    if dists_ref.dtype == jnp.bfloat16:
        t3 = jnp.dot(dists_ref[...], expand, preferred_element_type=f32)
    else:
        t = dists_ref[...].astype(f32)
        # Exact 3-way bf16 split: hi+mid+lo carry all 24 mantissa bits, and
        # each bf16 pass through the one-hot matrix accumulates exactly in
        # f32, so the expansion reproduces the f32 distances bit-exactly.
        t_hi = t.astype(jnp.bfloat16)
        r1 = t - t_hi.astype(f32)
        t_mid = r1.astype(jnp.bfloat16)
        t_lo = (r1 - t_mid.astype(f32)).astype(jnp.bfloat16)
        t3 = (jnp.dot(t_hi, expand, preferred_element_type=f32)
              + jnp.dot(t_mid, expand, preferred_element_type=f32)
              + jnp.dot(t_lo, expand, preferred_element_type=f32))

    # ---- per-lane origin / direction selection (VPU) ----------------------
    rays = rays_ref[...].astype(f32)              # (tr, 6)
    chan = chan_ref[...]                          # (1, 3tn): 0,1,2,0,1,2,...
    is0 = chan == 0
    is1 = chan == 1
    o3 = jnp.where(is0, rays[:, 0:1], jnp.where(is1, rays[:, 1:2], rays[:, 2:3]))
    d3 = jnp.where(is0, rays[:, 3:4], jnp.where(is1, rays[:, 4:5], rays[:, 5:6]))

    out_ref[...] = (o3 + d3 * t3).astype(out_ref.dtype)


def _channel_pattern(tn: int) -> jax.Array:
    return (jnp.arange(3 * tn, dtype=jnp.int32) % 3).reshape(1, 3 * tn)


def _expand_matrix(tn: int) -> jax.Array:
    n = jnp.arange(tn, dtype=jnp.int32).reshape(tn, 1)
    j = jnp.arange(3 * tn, dtype=jnp.int32).reshape(1, 3 * tn)
    return (j // 3 == n).astype(jnp.bfloat16)     # exact 0/1 in bf16


@functools.partial(jax.jit, static_argnames=("tile_r", "tile_n"))
def create_points_pallas(rays: jax.Array, dists: jax.Array, *,
                         tile_r: int = 2048, tile_n: int = 128) -> jax.Array:
    """points = rays[..., None, 0:3] + rays[..., None, 3:6] * dists[..., None]."""
    lead = rays.shape[:-1]
    if dists.shape[:-1] != lead:
        raise ValueError(
            f"rays leading dims {lead} must match dists leading dims "
            f"{dists.shape[:-1]}")
    if rays.shape[-1] < 6:
        raise ValueError("rays must carry at least 6 channels (origin+dir)")

    n_samples = dists.shape[-1]
    n_rays = math.prod(lead) if lead else 1
    out_dtype = jnp.result_type(rays.dtype, dists.dtype)

    rays2 = rays.reshape(n_rays, rays.shape[-1])[:, :6]    # (R, 6), tiny
    dists2 = dists.reshape(n_rays, n_samples)              # (R, N)

    # Ray tile: multiple of 8 sublanes (or the full extent).
    tr = n_rays if n_rays <= tile_r else max(8, (tile_r // 8) * 8)
    # Sample tile: multiple of 128 lanes (or the full extent).  Kept small so
    # the expand matmul's K stays 128 and the MXU never becomes the bottleneck.
    tn = n_samples if n_samples <= tile_n else max(128, (tile_n // 128) * 128)

    grid = (pl.cdiv(n_rays, tr), pl.cdiv(n_samples, tn))
    chan = _channel_pattern(tn)                    # (1, 3tn) int32
    expand = _expand_matrix(tn)                    # (tn, 3tn) bf16

    out2d = pl.pallas_call(
        _create_points_kernel,
        out_shape=jax.ShapeDtypeStruct((n_rays, 3 * n_samples), out_dtype),
        grid_spec=pltpu.PrefetchScalarGridSpec(
            num_scalar_prefetch=0,
            grid=grid,
            in_specs=[
                pl.BlockSpec((1, 3 * tn), lambda i, j: (0, 0)),   # chan (const)
                pl.BlockSpec((tn, 3 * tn), lambda i, j: (0, 0)),  # expand (const)
                pl.BlockSpec((tr, 6), lambda i, j: (i, 0)),       # rays tile
                pl.BlockSpec((tr, tn), lambda i, j: (i, j)),      # dists tile
            ],
            out_specs=pl.BlockSpec((tr, 3 * tn), lambda i, j: (i, j)),
        ),
        compiler_params=pltpu.CompilerParams(
            dimension_semantics=("parallel", "parallel"),
            vmem_limit_bytes=48 * 1024 * 1024,
        ),
    )(chan, expand, rays2, dists2)

    # Free row-major reshape: (R, 3N) interleaved -> [..., N, 3].
    return out2d.reshape(lead + (n_samples, 3))


class CreatePointsEmbedding:
    """JAX/Pallas port of nlf.embedding.point.CreatePointsEmbedding."""

    def __init__(self, in_channels, cfg, **kwargs):
        if isinstance(cfg, dict):
            has = lambda k: k in cfg
            get = lambda k: cfg[k]
        else:
            has = lambda k: hasattr(cfg, k)
            get = lambda k: getattr(cfg, k)

        self.group = get("group") if has("group") else kwargs.get("group", "embedding")
        self.cfg = cfg
        self.rays_name = get("rays_name") if has("rays_name") else "rays"
        self.out_points_field = (
            get("out_points_field") if has("out_points_field") else "points")
        # TODO(synk): the reference builds an activation here but never applies
        # it in forward(); we only record the name for attribute parity.
        self.activation = get("activation") if has("activation") else "sigmoid"
        self.cur_iter = 0

    def __call__(self, x: Dict[str, jax.Array],
                 render_kwargs: Dict[str, object]) -> Dict[str, jax.Array]:
        rays = x[self.rays_name]
        dists = x["distances"]
        out = dict(x)  # functional equivalent of the in-place dict update
        out[self.out_points_field] = create_points_pallas(rays, dists)
        return out

    def set_iter(self, i):
        self.cur_iter = i


if __name__ == "__main__":
    key = jax.random.PRNGKey(0)
    k1, k2 = jax.random.split(key)

    # Small deterministic inputs: 2 images x 64 rays, 8 ray channels
    # (origin(3) + direction(3) + 2 extras), 128 samples per ray.
    batch, n_rays, n_samples, ray_ch = 2, 64, 128, 8
    rays = jax.random.normal(k1, (batch, n_rays, ray_ch), dtype=jnp.float32)
    dists = jax.random.uniform(k2, (batch, n_rays, n_samples), dtype=jnp.float32)

    x = {
        "rays": rays,
        "distances": dists,
        "other_field": jnp.ones((batch, n_rays, 4), dtype=jnp.float32),
    }
    cfg = {"group": "embedding", "rays_name": "rays",
           "out_points_field": "points", "activation": "sigmoid"}
    module = CreatePointsEmbedding(in_channels=ray_ch, cfg=cfg)

    out = module(x, render_kwargs={})
    jax.block_until_ready(out)

    points = out["points"]
    assert points.shape == (batch, n_rays, n_samples, 3), points.shape
    ref = rays[..., None, 0:3] + rays[..., None, 3:6] * dists[..., None]
    assert points.dtype == ref.dtype
    assert bool(jnp.allclose(points, ref, atol=1e-6, rtol=1e-6))

    # Dict pass-through semantics (returned dict keeps all original fields).
    assert bool(jnp.array_equal(out["rays"], rays))
    assert bool(jnp.array_equal(out["distances"], dists))
    assert bool(jnp.array_equal(out["other_field"], x["other_field"]))

    print("KERNEL_OK")
</pallas_src>

<mosaic_0001>
module attributes {stable_mosaic.version = 11 : i64} {
  func.func @_create_points_kernel(%arg0: i32, %arg1: i32, %arg2: memref<1x384xi32, #tpu.memory_space<vmem>>, %arg3: memref<128x384xbf16, #tpu.memory_space<vmem>>, %arg4: memref<128x6xf32, #tpu.memory_space<vmem>>, %arg5: memref<128x128xf32, #tpu.memory_space<vmem>>, %arg6: memref<128x384xf32, #tpu.memory_space<vmem>>) attributes {dimension_semantics = [#tpu.dimension_semantics<parallel>, #tpu.dimension_semantics<parallel>], iteration_bounds = array<i64: 1, 1>, scalar_prefetch = 0 : i64, scratch_operands = 0 : i64, tpu.core_type = #tpu.core_type<tc>, window_params = [{pipeline_mode = #tpu.pipeline_mode<synchronous>, transform_indices = @transform_0, window_bounds = array<i64: 1, 384>}, {pipeline_mode = #tpu.pipeline_mode<synchronous>, transform_indices = @transform_1, window_bounds = array<i64: 128, 384>}, {transform_indices = @transform_2, window_bounds = array<i64: 128, 6>}, {transform_indices = @transform_3, window_bounds = array<i64: 128, 128>}, {transform_indices = @transform_4, window_bounds = array<i64: 128, 384>}]} {
    %c0 = arith.constant 0 : index
    %c0_0 = arith.constant 0 : index
    %0 = vector.load %arg3[%c0, %c0_0] : memref<128x384xbf16, #tpu.memory_space<vmem>>, vector<128x384xbf16>
    %c0_1 = arith.constant 0 : index
    %c0_2 = arith.constant 0 : index
    %1 = vector.load %arg5[%c0_1, %c0_2] : memref<128x128xf32, #tpu.memory_space<vmem>>, vector<128x128xf32>
    %2 = arith.truncf %1 : vector<128x128xf32> to vector<128x128xbf16>
    %3 = arith.extf %2 : vector<128x128xbf16> to vector<128x128xf32>
    %4 = arith.subf %1, %3 : vector<128x128xf32>
    %5 = arith.truncf %4 : vector<128x128xf32> to vector<128x128xbf16>
    %6 = arith.extf %5 : vector<128x128xbf16> to vector<128x128xf32>
    %7 = arith.subf %4, %6 : vector<128x128xf32>
    %8 = arith.truncf %7 : vector<128x128xf32> to vector<128x128xbf16>
    %cst = arith.constant dense<0.000000e+00> : vector<128x384xf32>
    %9 = tpu.matmul %2, %0, %cst {dimension_numbers = #tpu.dot_dimension_numbers<[1], [0], [0], [1], [0, 0, 1, 1], [], []>} : vector<128x128xbf16>, vector<128x384xbf16>, vector<128x384xf32> -> vector<128x384xf32>
    %cst_3 = arith.constant dense<0.000000e+00> : vector<128x384xf32>
    %10 = tpu.matmul %5, %0, %cst_3 {dimension_numbers = #tpu.dot_dimension_numbers<[1], [0], [0], [1], [0, 0, 1, 1], [], []>} : vector<128x128xbf16>, vector<128x384xbf16>, vector<128x384xf32> -> vector<128x384xf32>
    %11 = arith.addf %9, %10 : vector<128x384xf32>
    %cst_4 = arith.constant dense<0.000000e+00> : vector<128x384xf32>
    %12 = tpu.matmul %8, %0, %cst_4 {dimension_numbers = #tpu.dot_dimension_numbers<[1], [0], [0], [1], [0, 0, 1, 1], [], []>} : vector<128x128xbf16>, vector<128x384xbf16>, vector<128x384xf32> -> vector<128x384xf32>
    %13 = arith.addf %11, %12 : vector<128x384xf32>
    %c0_5 = arith.constant 0 : index
    %c0_6 = arith.constant 0 : index
    %14 = vector.load %arg4[%c0_5, %c0_6] : memref<128x6xf32, #tpu.memory_space<vmem>>, vector<128x6xf32>
    %c0_7 = arith.constant 0 : index
    %c0_8 = arith.constant 0 : index
    %15 = vector.load %arg2[%c0_7, %c0_8] : memref<1x384xi32, #tpu.memory_space<vmem>>, vector<1x384xi32>
    %c0_i32 = arith.constant 0 : i32
    %16 = vector.broadcast %c0_i32 : i32 to vector<1x384xi32>
    %17 = arith.cmpi eq, %15, %16 : vector<1x384xi32>
    %c1_i32 = arith.constant 1 : i32
    %18 = vector.broadcast %c1_i32 : i32 to vector<1x384xi32>
    %19 = arith.cmpi eq, %15, %18 : vector<1x384xi32>
    %20 = vector.extract_strided_slice %14 {offsets = [0, 0], sizes = [128, 1], strides = [1, 1]} : vector<128x6xf32> to vector<128x1xf32>
    %21 = vector.extract_strided_slice %14 {offsets = [0, 1], sizes = [128, 1], strides = [1, 1]} : vector<128x6xf32> to vector<128x1xf32>
    %22 = vector.extract_strided_slice %14 {offsets = [0, 2], sizes = [128, 1], strides = [1, 1]} : vector<128x6xf32> to vector<128x1xf32>
    %23 = vector.shape_cast %19 : vector<1x384xi1> to vector<1x384xi1>
    %24 = vector.broadcast %23 : vector<1x384xi1> to vector<128x384xi1>
    %25 = vector.shape_cast %21 : vector<128x1xf32> to vector<128x1xf32>
    %26 = vector.broadcast %25 : vector<128x1xf32> to vector<128x384xf32>
    %27 = vector.shape_cast %22 : vector<128x1xf32> to vector<128x1xf32>
    %28 = vector.broadcast %27 : vector<128x1xf32> to vector<128x384xf32>
    %29 = arith.select %24, %26, %28 : vector<128x384xi1>, vector<128x384xf32>
    %30 = vector.shape_cast %17 : vector<1x384xi1> to vector<1x384xi1>
    %31 = vector.broadcast %30 : vector<1x384xi1> to vector<128x384xi1>
    %32 = vector.shape_cast %20 : vector<128x1xf32> to vector<128x1xf32>
    %33 = vector.broadcast %32 : vector<128x1xf32> to vector<128x384xf32>
    %34 = arith.select %31, %33, %29 : vector<128x384xi1>, vector<128x384xf32>
    %35 = vector.extract_strided_slice %14 {offsets = [0, 3], sizes = [128, 1], strides = [1, 1]} : vector<128x6xf32> to vector<128x1xf32>
    %36 = vector.extract_strided_slice %14 {offsets = [0, 4], sizes = [128, 1], strides = [1, 1]} : vector<128x6xf32> to vector<128x1xf32>
    %37 = vector.extract_strided_slice %14 {offsets = [0, 5], sizes = [128, 1], strides = [1, 1]} : vector<128x6xf32> to vector<128x1xf32>
    %38 = vector.shape_cast %19 : vector<1x384xi1> to vector<1x384xi1>
    %39 = vector.broadcast %38 : vector<1x384xi1> to vector<128x384xi1>
    %40 = vector.shape_cast %36 : vector<128x1xf32> to vector<128x1xf32>
    %41 = vector.broadcast %40 : vector<128x1xf32> to vector<128x384xf32>
    %42 = vector.shape_cast %37 : vector<128x1xf32> to vector<128x1xf32>
    %43 = vector.broadcast %42 : vector<128x1xf32> to vector<128x384xf32>
    %44 = arith.select %39, %41, %43 : vector<128x384xi1>, vector<128x384xf32>
    %45 = vector.shape_cast %17 : vector<1x384xi1> to vector<1x384xi1>
    %46 = vector.broadcast %45 : vector<1x384xi1> to vector<128x384xi1>
    %47 = vector.shape_cast %35 : vector<128x1xf32> to vector<128x1xf32>
    %48 = vector.broadcast %47 : vector<128x1xf32> to vector<128x384xf32>
    %49 = arith.select %46, %48, %44 : vector<128x384xi1>, vector<128x384xf32>
    %50 = arith.mulf %49, %13 : vector<128x384xf32>
    %51 = arith.addf %34, %50 : vector<128x384xf32>
    %c0_9 = arith.constant 0 : index
    %c0_10 = arith.constant 0 : index
    %52 = vector.load %arg6[%c0_9, %c0_10] : memref<128x384xf32, #tpu.memory_space<vmem>>, vector<128x384xf32>
    tpu.vector_store %arg6[%c0_9, %c0_10], %51 {strides = array<i32>} : memref<128x384xf32, #tpu.memory_space<vmem>>, vector<128x384xf32>,
    return
  }
  func.func @transform_0(%arg0: i32, %arg1: i32) -> (i32, i32) {
    %c0_i32 = arith.constant 0 : i32
    %c0_i32_0 = arith.constant 0 : i32
    %c0_i32_1 = arith.constant 0 : i32
    return %c0_i32, %c0_i32_0 : i32, i32
  }
  func.func @transform_1(%arg0: i32, %arg1: i32) -> (i32, i32) {
    %c0_i32 = arith.constant 0 : i32
    %c0_i32_0 = arith.constant 0 : i32
    %c0_i32_1 = arith.constant 0 : i32
    return %c0_i32, %c0_i32_0 : i32, i32
  }
  func.func @transform_2(%arg0: i32, %arg1: i32) -> (i32, i32) {
    %c0_i32 = arith.constant 0 : i32
    %c0_i32_0 = arith.constant 0 : i32
    return %arg0, %c0_i32 : i32, i32
  }
  func.func @transform_3(%arg0: i32, %arg1: i32) -> (i32, i32) {
    %c0_i32 = arith.constant 0 : i32
    return %arg0, %arg1 : i32, i32
  }
  func.func @transform_4(%arg0: i32, %arg1: i32) -> (i32, i32) {
    %c0_i32 = arith.constant 0 : i32
    return %arg0, %arg1 : i32, i32
  }
}

</mosaic_0001>

<bundles_post_ra>
// kernel: create_points_pallas.1
= control target key start
LH: loop header
LB: loop body
LE: loop exit
PB: predicated region body
PF: predicated region fallthrough
CT: control target
= control target key end

     0   :  { %v1839_v0 = vmov 1   ;;  %s4234_s2 = inlined_call_operand.vmem [shape: f32[128,6], index: 2, kind: input, shape index: {}]   ;;  %s4235_s1 = inlined_call_operand.vmem [shape: bf16[128,384], index: 1, kind: input, shape index: {}]   ;;  %s4236_s3 = inlined_call_operand.vmem [shape: f32[128,128], index: 3, kind: input, shape index: {}]   ;;  %s4237_s0 = inlined_call_operand.vmem [shape: s32[1,384], index: 0, kind: input, shape index: {}]   ;;  %s4238_s4 = inlined_call_operand.vmem [shape: f32[128,384], index: 4, kind: output, shape index: {}]  }
   0x1   :  { %1807 = vset.pattern.permute.xlu2 %v1839_v0  ;;  %1806 = vset.pattern.permute.xlu1 %v1839_v0  ;;  %v1873_v1 = vld [vmem:[%s4234_s2 + $0x20] sm:$0xff]  ;;  %v1878_v2 = vld [vmem:[%s4234_s2 + $0x10] sm:$0xff]  ;;  %v1741_v4 = vld [vmem:[%s4235_s1 + $0xa8] sm:$0xf] }
   0x2   :  { %v1883_v3 = vld [vmem:[%s4234_s2] sm:$0xff]  ;;  %1805 = vset.pattern.permute.xlu0 %v1839_v0  ;;  %930 = vperm.xlu2 %1807, %v1873_v1   ;;  %v1773_v5 = vld [vmem:[%s4235_s1 + $0xb0] sm:$0xf0]  ;;  %v1729_v6 = vld [vmem:[%s4235_s1 + $0x90] sm:$0xf] }
   0x3   :  { %920 = vperm.xlu1 %1806, %v1878_v2   ;;  %910 = vperm.xlu0 %1805, %v1883_v3   ;;  %v1897_v7 = vor.u32 %v1773_v5, %v1741_v4  ;;  %v1770_v8 = vld [vmem:[%s4235_s1 + $0x98] sm:$0xf0]  ;;  %v1717_v10 = vld [vmem:[%s4235_s1 + $0x78] sm:$0xf]  ;;  %v1767_v11 = vld [vmem:[%s4235_s1 + $0x80] sm:$0xf0] }
   0x4   :  { %v1904_v9 = vor.u32 %v1770_v8, %v1729_v6  ;;  %v1917_v12 = vld [vmem:[%s4234_s2 + $0x28] sm:$0xff]  ;;  %v1922_v13 = vld [vmem:[%s4234_s2 + $0x18] sm:$0xff]  ;;  %v1931_v15 = vor.u32 %v1767_v11, %v1717_v10  ;;  %v1705_v16 = vld [vmem:[%s4235_s1 + $0x60] sm:$0xf] }
   0x5   :  { %345 = vmatpush.bf16.msra.mxu0 %v1897_v7  ;;  %1775 = vmatpush.bf16.msra.mxu1 %v1897_v7  ;;  %v1929_v14 = vld [vmem:[%s4234_s2 + $0x8] sm:$0xff]  ;;  %v49_v18 = vld [vmem:[%s4236_s3] sm:$0xff]  ;;  %v1761_v33 = vld [vmem:[%s4235_s1 + $0x50] sm:$0xf0] }
   0x6   :  { %1776 = vmatpush.bf16.msra.mxu2 %v1897_v7  ;;  %1777 = vmatpush.bf16.msra.mxu3 %v1897_v7  ;;  %v1764_v17 = vld [vmem:[%s4235_s1 + $0x68] sm:$0xf0]  ;;  %v1952_v21 = vpack.c.bf16 %v49_v18, %v49_v18  ;;  %v53_v23 = vld [vmem:[%s4236_s3 + $0x20] sm:$0xff]  ;;  %v1693_v32 = vld [vmem:[%s4235_s1 + $0x48] sm:$0xf] }
   0x7   :  { %v50_v19 = vld [vmem:[%s4236_s3 + $0x8] sm:$0xff]  ;;  %v1950_v20 = vor.u32 %v1764_v17, %v1705_v16  ;;  %v57_v25 = vld [vmem:[%s4236_s3 + $0x40] sm:$0xff]  ;;  %v1967_v26 = vpack.c.bf16 %v53_v23, %v53_v23  ;;  %v2004_v38 = vld [vmem:[%s4234_s2 + $0x38] sm:$0xff]  ;;  %v2017_v44 = vor.u32 %v1761_v33, %v1693_v32 }
   0x8   :  { %v1954_v22 = vpack.c.bf16 %v50_v19, %v50_v19  ;;  %v54_v24 = vld [vmem:[%s4236_s3 + $0x28] sm:$0xff]  ;;  %v1974_v29 = vpack.c.bf16 %v57_v25, %v57_v25  ;;  %v61_v30 = vld [vmem:[%s4236_s3 + $0x60] sm:$0xff]  ;;  %v81_v39 = vunpack.c.l.bf16 %v1952_v21  ;;  %v2015_v43 = vld [vmem:[%s4234_s2 + $0x30] sm:$0xff] }
   0x9   :  { %346 = vmatpush.bf16.msra.mxu0 %v1904_v9  ;;  %1778 = vmatpush.bf16.msra.mxu1 %v1904_v9  ;;  %v1969_v27 = vpack.c.bf16 %v54_v24, %v54_v24  ;;  %v58_v28 = vld [vmem:[%s4236_s3 + $0x48] sm:$0xff]  ;;  %v1992_v35 = vpack.c.bf16 %v61_v30, %v61_v30  ;;  %v1999_v37 = vld [vmem:[%s4234_s2 + $0x40] sm:$0xff]  ;;  %v85_v41 = vunpack.c.l.bf16 %v1967_v26  ;;  %v1681_v47 = vld [vmem:[%s4235_s1 + $0x30] sm:$0xf] }
   0xa   :  { %1779 = vmatpush.bf16.msra.mxu2 %v1904_v9  ;;  %1780 = vmatpush.bf16.msra.mxu3 %v1904_v9  ;;  %v62_v31 = vld [vmem:[%s4236_s3 + $0x68] sm:$0xff]  ;;  %v1990_v34 = vpack.c.bf16 %v58_v28, %v58_v28  ;;  %v82_v40 = vunpack.c.l.bf16 %v1954_v22  ;;  %v89_v45 = vunpack.c.l.bf16 %v1974_v29  ;;  %v1758_v48 = vld [vmem:[%s4235_s1 + $0x38] sm:$0xf0]  ;;  %v2034_v51 = vsub.f32 %v49_v18, %v81_v39  ;;  %v1669_v58 = vld [vmem:[%s4235_s1 + $0x18] sm:$0xf] }
   0xb   :  { %935 = vperm.xlu2 %1807, %v1917_v12   ;;  %925 = vperm.xlu1 %1806, %v1922_v13   ;;  %4310 = vst [vmem:[#allocation3_spill] sm:$0xff] %v1992_v35  ;;  %v1994_v36 = vpack.c.bf16 %v62_v31, %v62_v31  ;;  %v86_v42 = vunpack.c.l.bf16 %v1969_v27  ;;  %v93_v49 = vunpack.c.l.bf16 %v1992_v35  ;;  %v2038_v53 = vsub.f32 %v53_v23, %v85_v41  ;;  %v1755_v59 = vld [vmem:[%s4235_s1 + $0x20] sm:$0xf0]  ;;  %v2065_v62 = vld [vmem:[%s4234_s2 + $0x58] sm:$0xff]  ;;  %v2070_v63 = vld [vmem:[%s4234_s2 + $0x50] sm:$0xff] }
   0xc   :  { %915 = vperm.xlu0 %1805, %v1929_v14   ;;  %4309 = vst [vmem:[#allocation2_spill] sm:$0xff] %v1990_v34  ;;  %v90_v46 = vunpack.c.l.bf16 %v1990_v34  ;;  %v2036_v52 = vsub.f32 %v50_v19, %v82_v40  ;;  %v2044_v55 = vor.u32 %v1758_v48, %v1681_v47  ;;  %v2046_v56 = vsub.f32 %v57_v25, %v89_v45  ;;  %v1657_v0 = vld [vmem:[%s4235_s1] sm:$0xf]  ;;  %v1752_v4 = vld [vmem:[%s4235_s1 + $0x8] sm:$0xf0]  ;;  %v2129_v25 = vld [vmem:[%s4236_s3 + $0x18] sm:$0xff] }
   0xd   :  { %347 = vmatpush.bf16.msra.mxu0 %v1931_v15  ;;  %1781 = vmatpush.bf16.msra.mxu1 %v1931_v15  ;;  %4311 = vst [vmem:[#allocation4_spill] sm:$0xff] %v1994_v36  ;;  %v94_v50 = vunpack.c.l.bf16 %v1994_v36  ;;  %v2040_v54 = vsub.f32 %v54_v24, %v86_v42  ;;  %v2058_v60 = vsub.f32 %v61_v30, %v93_v49  ;;  %v2099_v11 = vld [vmem:[%s4234_s2 + $0x48] sm:$0xff]  ;;  %v2124_v24 = vld [vmem:[%s4236_s3 + $0x10] sm:$0xff]  ;;  %v2148_v40 = vld [vmem:[%s4236_s3 + $0x38] sm:$0xff] }
   0xe   :  { %1782 = vmatpush.bf16.msra.mxu2 %v1931_v15  ;;  %1783 = vmatpush.bf16.msra.mxu3 %v1931_v15  ;;  %4312 = vst [vmem:[#allocation5_spill] sm:$0xff] %v2034_v51  ;;  %v2048_v57 = vsub.f32 %v58_v28, %v90_v46  ;;  %v2080_v5 = vpack.c.bf16 %v2034_v51, %v2034_v51  ;;  %v2143_v39 = vld [vmem:[%s4236_s3 + $0x30] sm:$0xff]  ;;  %v2170_v48 = vld [vmem:[%s4236_s3 + $0x58] sm:$0xff] }
   0xf   :  { %4313 = vst [vmem:[#allocation6_spill] sm:$0xff] %v2036_v52  ;;  %v2060_v61 = vsub.f32 %v62_v31, %v94_v50  ;;  %v2084_v6 = vpack.c.bf16 %v2036_v52, %v2036_v52  ;;  %v2088_v8 = vpack.c.bf16 %v2038_v53, %v2038_v53  ;;  %v2092_v10 = vpack.c.bf16 %v2040_v54, %v2040_v54  ;;  %v2153_v41 = vld [vmem:[%s4236_s3 + $0x50] sm:$0xff]  ;;  %v2180_v50 = vld [vmem:[%s4236_s3 + $0x78] sm:$0xff] }
  0x10   :  { %4314 = vst [vmem:[#allocation7_spill] sm:$0xff] %v2038_v53  ;;  %v2101_v16 = vor.u32 %v1755_v59, %v1669_v58  ;;  %v2105_v17 = vpack.c.bf16 %v2046_v56, %v2046_v56  ;;  %v2109_v18 = vpack.c.bf16 %v2048_v57, %v2048_v57  ;;  %v2115_v19 = vpack.c.bf16 %v2058_v60, %v2058_v60  ;;  %v2175_v49 = vld [vmem:[%s4236_s3 + $0x70] sm:$0xff]  ;;  %v1737_v35 = vld [vmem:[%s4235_s1 + $0x98] sm:$0xf] }
  0x11   :  { %348 = vmatpush.bf16.msra.mxu0 %v1950_v20  ;;  %1784 = vmatpush.bf16.msra.mxu1 %v1950_v20  ;;  %4315 = vst [vmem:[#allocation8_spill] sm:$0xff] %v2040_v54  ;;  %v2119_v23 = vpack.c.bf16 %v2060_v61, %v2060_v61  ;;  %v2133_v28 = vor.u32 %v1752_v4, %v1657_v0  ;;  %v185_v30 = vunpack.c.l.b16 %v2080_v5  ;;  %v186_v31 = vunpack.c.l.b16 %v2084_v6  ;;  %v2189_v0 = vld [vmem:[%s4234_s2 + $0x70] sm:$0xff] }
  0x12   :  { %1785 = vmatpush.bf16.msra.mxu2 %v1950_v20  ;;  %1786 = vmatpush.bf16.msra.mxu3 %v1950_v20  ;;  %4316 = vst [vmem:[#allocation9_spill] sm:$0xff] %v2046_v56  ;;  %v189_v32 = vunpack.c.l.b16 %v2088_v8  ;;  %v190_v33 = vunpack.c.l.b16 %v2092_v10  ;;  %v193_v42 = vunpack.c.l.b16 %v2105_v17  ;;  %v194_v45 = vunpack.c.l.b16 %v2109_v18  ;;  %v1749_v4 = vld [vmem:[%s4235_s1 + $0xb0] sm:$0xf] }
  0x13   :  { %950 = vperm.xlu2 %1807, %v1999_v37   ;;  %945 = vperm.xlu1 %1806, %v2004_v38   ;;  %4317 = vst [vmem:[#allocation10_spill] sm:$0xff] %v2048_v57  ;;  %v2161_v46 = vpack.c.bf16 %v2124_v24, %v2124_v24  ;;  %v2165_v47 = vpack.c.bf16 %v2129_v25, %v2129_v25  ;;  %v197_v58 = vunpack.c.l.b16 %v2115_v19  ;;  %v198_v59 = vunpack.c.l.b16 %v2119_v23  ;;  %v2212_v57 = vld [vmem:[%s4234_s2 + $0x68] sm:$0xff] }
  0x14   :  { %940 = vperm.xlu0 %1805, %v2015_v43   ;;  %4318 = vst [vmem:[#allocation11_spill] sm:$0xff] %v2058_v60  ;;  %v2199_v60 = vpack.c.bf16 %v2143_v39, %v2143_v39  ;;  %v2214_v56 = vpack.c.b16 %v186_v31, %v185_v30  ;;  %v2224_v54 = vpack.c.bf16 %v2170_v48, %v2170_v48  ;;  %v2239_v31 = vld [vmem:[%s4234_s2 + $0x60] sm:$0xff] }
  0x15   :  { %349 = vmatpush.bf16.msra.mxu0 %v2017_v44  ;;  %1787 = vmatpush.bf16.msra.mxu1 %v2017_v44  ;;  %4319 = vst [vmem:[#allocation12_spill] sm:$0xff] %v2060_v61  ;;  %v1774_v61 = vld [vmem:[%s4235_s1 + $0xb8] sm:$0xf0]  ;;  %v2228_v53 = vpack.c.bf16 %v2175_v49, %v2175_v49  ;;  %v2232_v30 = vpack.c.bf16 %v2180_v50, %v2180_v50  ;;  %v83_v52 = vunpack.c.l.bf16 %v2161_v46  ;;  %v84_v51 = vunpack.c.l.bf16 %v2165_v47 }
  0x16   :  { %1788 = vmatpush.bf16.msra.mxu2 %v2017_v44  ;;  %1789 = vmatpush.bf16.msra.mxu3 %v2017_v44  ;;  %4320 = vst [vmem:[#allocation13_spill] sm:$0xff] %v2080_v5  ;;  %v2251_v36 = vor.u32 %v1774_v61, %v1749_v4  ;;  %v1731_v61 = vld [vmem:[%s4235_s1 + $0x9c] sm:$0xf0] }
  0x17   :  { %4321 = vst [vmem:[#allocation14_spill] sm:$0xff] %v2084_v6  ;;  %v2249_v6 = vpack.c.b16 %v198_v59, %v197_v58  ;;  %v96_v4 = vunpack.c.l.bf16 %v2232_v30  ;;  %v2280_v5 = vsub.f32 %v2124_v24, %v83_v52  ;;  %v2283_v34 = vsub.f32 %v2129_v25, %v84_v51  ;;  %v1768_v51 = vld [vmem:[%s4235_s1 + $0x88] sm:$0xf0]  ;;  %v1766_v52 = vld [vmem:[%s4235_s1 + $0x7c] sm:$0xf] }
  0x18   :  { %4322 = vst [vmem:[#allocation15_spill] sm:$0xff] %v2088_v8  ;;  %v2243_v8 = vpack.c.b16 %v194_v45, %v193_v42  ;;  %v1769_v42 = vld [vmem:[%s4235_s1 + $0x94] sm:$0xf]  ;;  %v87_v45 = vunpack.c.l.bf16 %v2199_v60 }
  0x19   :  { %4323 = vst [vmem:[#allocation16_spill] sm:$0xff] %v2092_v10  ;;  %350 = vmatpush.bf16.msra.mxu0 %v2044_v55  ;;  %1790 = vmatpush.bf16.msra.mxu1 %v2044_v55  ;;  %v2241_v10 = vpack.c.b16 %v190_v33, %v189_v32  ;;  %v1771_v33 = vld [vmem:[%s4235_s1 + $0xa0] sm:$0xf0] }
  0x1a   :  { %4324 = vst [vmem:[#allocation17_spill] sm:$0xff] %v2105_v17  ;;  %1791 = vmatpush.bf16.msra.mxu2 %v2044_v55  ;;  %1792 = vmatpush.bf16.msra.mxu3 %v2044_v55  ;;  %v1743_v17 = vld [vmem:[%s4235_s1 + $0xb4] sm:$0xf0]  ;;  %v2306_v24 = vsub.f32 %v2143_v39, %v87_v45  ;;  %v2326_v39 = vpack.c.bf16 %v2280_v5, %v2280_v5 }
  0x1b   :  { %4325 = vst [vmem:[#allocation18_spill] sm:$0xff] %v2109_v18  ;;  %965 = vperm.xlu2 %1807, %v2065_v62   ;;  %960 = vperm.xlu1 %1806, %v2070_v63   ;;  %v1772_v18 = vld [vmem:[%s4235_s1 + $0xac] sm:$0xf] }
  0x1c   :  { %4326 = vst [vmem:[#allocation19_spill] sm:$0xff] %v2115_v19  ;;  %955 = vperm.xlu0 %1805, %v2099_v11   ;;  %v2207_v19 = vpack.c.bf16 %v2153_v41, %v2153_v41  ;;  %v2258_v32 = vor.u32 %v1772_v18, %v1743_v17  ;;  %v92_v17 = vunpack.c.l.bf16 %v2224_v54  ;;  %v95_v18 = vunpack.c.l.bf16 %v2228_v53 }
  0x1d   :  { %4327 = vst [vmem:[#allocation20_spill] sm:$0xff] %v2119_v23  ;;  %351 = vmatpush.bf16.msra.mxu0 %v2101_v16  ;;  %1793 = vmatpush.bf16.msra.mxu1 %v2101_v16  ;;  %v2203_v23 = vpack.c.bf16 %v2148_v40, %v2148_v40  ;;  %v2349_v45 = vpack.c.bf16 %v2306_v24, %v2306_v24 }
  0x1e   :  { %1794 = vmatpush.bf16.msra.mxu2 %v2101_v16  ;;  %1795 = vmatpush.bf16.msra.mxu3 %v2101_v16  ;;  %4328 = vst [vmem:[#allocation21_spill] sm:$0xff] %v2207_v19  ;;  %v91_v59 = vunpack.c.l.bf16 %v2207_v19  ;;  %v2287_v19 = vor.u32 %v1771_v33, %v1737_v35  ;;  %v1719_v35 = vld [vmem:[%s4235_s1 + $0x84] sm:$0xf0] }
  0x1f   :  { %4329 = vst [vmem:[#allocation22_spill] sm:$0xff] %v2224_v54  ;;  %v88_v58 = vunpack.c.l.bf16 %v2203_v23  ;;  %v2289_v54 = vor.u32 %v1769_v42, %v1731_v61  ;;  %v2316_v42 = vsub.f32 %v2170_v48, %v92_v17  ;;  %v2319_v61 = vsub.f32 %v2175_v49, %v95_v18  ;;  %v1765_v17 = vld [vmem:[%s4235_s1 + $0x70] sm:$0xf0]  ;;  %v1763_v18 = vld [vmem:[%s4235_s1 + $0x64] sm:$0xf] }
  0x20   :  { %4330 = vst [vmem:[#allocation23_spill] sm:$0xff] %v2228_v53  ;;  %v2312_v33 = vsub.f32 %v2153_v41, %v91_v59  ;;  %v2322_v53 = vsub.f32 %v2180_v50, %v96_v4  ;;  %v2336_v41 = vld [vmem:[%s4234_s2 + $0x78] sm:$0xff]  ;;  %v2340_v49 = vor.u32 %v1766_v52, %v1719_v35  ;;  %v1713_v50 = vld [vmem:[%s4235_s1 + $0x68] sm:$0xf]  ;;  %v1840_v59 = vmov 2  }
  0x21   :  { %4331 = vst [vmem:[#allocation24_spill] sm:$0xff] %v2232_v30  ;;  %352 = vmatpush.bf16.msra.mxu0 %v2133_v28  ;;  %1796 = vmatpush.bf16.msra.mxu1 %v2133_v28  ;;  %v1725_v30 = vld [vmem:[%s4235_s1 + $0x80] sm:$0xf]  ;;  %v2309_v25 = vsub.f32 %v2148_v40, %v88_v58  ;;  %v2330_v40 = vpack.c.bf16 %v2283_v34, %v2283_v34  ;;  %v1707_v4 = vld [vmem:[%s4235_s1 + $0x6c] sm:$0xf0] }
  0x22   :  { %1797 = vmatpush.bf16.msra.mxu2 %v2133_v28  ;;  %1798 = vmatpush.bf16.msra.mxu3 %v2133_v28  ;;  %4332 = vst [vmem:[#allocation25_spill] sm:$0xff] %v2280_v5  ;;  %v2338_v48 = vor.u32 %v1768_v51, %v1725_v30  ;;  %v2357_v30 = vpack.c.bf16 %v2312_v33, %v2312_v33 }
  0x23   :  { %980 = vperm.xlu2 %1807, %v2189_v0   ;;  %975 = vperm.xlu1 %1806, %v2212_v57   ;;  %4333 = vst [vmem:[#allocation26_spill] sm:$0xff] %v2283_v34  ;;  %v2353_v58 = vpack.c.bf16 %v2309_v25, %v2309_v25  ;;  %v2371_v51 = vpack.c.bf16 %v2316_v42, %v2316_v42 }
  0x24   :  { %970 = vperm.xlu0 %1805, %v2239_v31   ;;  %353 = vmatmul.bf16.vlgmr.msra.gmra.mxu0 %v2214_v56  ;;  %4334 = vst [vmem:[#allocation27_spill] sm:$0xff] %v2306_v24  ;;  %v2375_v52 = vpack.c.bf16 %v2319_v61, %v2319_v61  ;;  %v2379_v35 = vpack.c.bf16 %v2322_v53, %v2322_v53  ;;  %v195_v34 = vunpack.c.l.b16 %v2357_v30 }
  0x25   :  { %363 = vmatmul.bf16.vlgmr.msra.gmra.mxu1 %v2241_v10  ;;  %373 = vmatmul.bf16.vlgmr.msra.gmra.mxu2 %v2243_v8  ;;  %4335 = vst [vmem:[#allocation28_spill] sm:$0xff] %v2309_v25  ;;  %v188_v25 = vunpack.c.l.b16 %v2330_v40  ;;  %v192_v24 = vunpack.c.l.b16 %v2353_v58  ;;  %v196_v5 = vunpack.c.l.b16 %v2371_v51 }
  0x26   :  { %383 = vmatmul.bf16.vlgmr.msra.gmra.mxu3 %v2249_v6  ;;  %443 = vmatpush.bf16.msrb.mxu2 %v2251_v36  ;;  %4336 = vst [vmem:[#allocation29_spill] sm:$0xff] %v2312_v33  ;;  %v187_v33 = vunpack.c.l.b16 %v2326_v39 }
  0x27   :  { %540 = vmatpush.bf16.msrb.mxu3 %v1897_v7  ;;  %394 = vmatpush.bf16.msrb.mxu1 %v2258_v32  ;;  %4337 = vst [vmem:[#allocation30_spill] sm:$0xff] %v2316_v42  ;;  %v2390_v42 = vor.u32 %v1763_v18, %v1707_v4  ;;  %v1762_v18 = vld [vmem:[%s4235_s1 + $0x58] sm:$0xf0] }
  0x28   :  { %589 = vmatpush.bf16.msrb.mxu0 %v2258_v32  ;;  %4338 = vst [vmem:[#allocation31_spill] sm:$0xff] %v2319_v61  ;;  %v2388_v61 = vor.u32 %v1765_v17, %v1713_v50  ;;  %v2400_v50 = vpack.c.b16 %v188_v25, %v187_v33  ;;  %v1701_v17 = vld [vmem:[%s4235_s1 + $0x50] sm:$0xf]  ;;  %v1695_v25 = vld [vmem:[%s4235_s1 + $0x54] sm:$0xf0]  ;;  %v2420_v33 = vpack.c.b16 %v196_v5, %v195_v34 }
  0x29   :  { %4339 = vst [vmem:[#allocation32_spill] sm:$0xff] %v2322_v53  ;;  %v191_v53 = vunpack.c.l.b16 %v2349_v45  ;;  %v1759_v34 = vld [vmem:[%s4235_s1 + $0x40] sm:$0xf0]  ;;  %v1757_v5 = vld [vmem:[%s4235_s1 + $0x34] sm:$0xf] }
  0x2a   :  { %4340 = vst [vmem:[#allocation33_spill] sm:$0xff] %v2326_v39  ;;  %444 = vmatpush.bf16.msrb.mxu2 %v2287_v19  ;;  %v200_v39 = vunpack.c.l.b16 %v2379_v35 }
  0x2b   :  { %4341 = vst [vmem:[#allocation34_spill] sm:$0xff] %v2330_v40  ;;  %541 = vmatpush.bf16.msrb.mxu3 %v1904_v9  ;;  %395 = vmatpush.bf16.msrb.mxu1 %v2289_v54  ;;  %v199_v40 = vunpack.c.l.b16 %v2375_v52  ;;  %v2410_v4 = vpack.c.b16 %v192_v24, %v191_v53  ;;  %v2425_v53 = vor.u32 %v1762_v18, %v1701_v17  ;;  %v1756_v17 = vld [vmem:[%s4235_s1 + $0x28] sm:$0xf0]  ;;  %v1754_v18 = vld [vmem:[%s4235_s1 + $0x1c] sm:$0xf] }
  0x2c   :  { %4342 = vst [vmem:[#allocation35_spill] sm:$0xff] %v2349_v45  ;;  %590 = vmatpush.bf16.msrb.mxu0 %v2289_v54  ;;  %1809 = vset.pattern.permute.xlu2 %v1840_v59 }
  0x2d   :  { %4343 = vst [vmem:[#allocation36_spill] sm:$0xff] %v2353_v58  ;;  %1808 = vset.pattern.permute.xlu1 %v1840_v59  ;;  %985 = vperm.xlu0 %1805, %v2336_v41  }
  0x2e   :  { %4344 = vst [vmem:[#allocation37_spill] sm:$0xff] %v2357_v30  ;;  %993 = vperm.xlu2 %1809, %v1929_v14   ;;  %989 = vperm.xlu1 %1808, %v1883_v3   ;;  %v509_v30 = vunpack.c.l.b16 %v1954_v22  ;;  %v513_v22 = vunpack.c.l.b16 %v1969_v27  ;;  %v514_v27 = vunpack.c.l.b16 %v2199_v60 }
  0x2f   :  { %4345 = vst [vmem:[#allocation38_spill] sm:$0xff] %v2371_v51  ;;  %445 = vmatpush.bf16.msrb.mxu2 %v2338_v48  ;;  %542 = vmatpush.bf16.msrb.mxu3 %v1931_v15  ;;  %v1689_v51 = vld [vmem:[%s4235_s1 + $0x38] sm:$0xf] }
  0x30   :  { %4346 = vst [vmem:[#allocation39_spill] sm:$0xff] %v2375_v52  ;;  %396 = vmatpush.bf16.msrb.mxu1 %v2340_v49  ;;  %591 = vmatpush.bf16.msrb.mxu0 %v2340_v49  ;;  %v2422_v52 = vpack.c.b16 %v200_v39, %v199_v40  ;;  %v1683_v39 = vld [vmem:[%s4235_s1 + $0x3c] sm:$0xf0]  ;;  %v2449_v40 = vor.u32 %v1759_v34, %v1689_v51  ;;  %v1671_v51 = vld [vmem:[%s4235_s1 + $0x24] sm:$0xf0] }
  0x31   :  { %4347 = vst [vmem:[#allocation40_spill] sm:$0xff] %v2379_v35  ;;  %v1760_v35 = vld [vmem:[%s4235_s1 + $0x4c] sm:$0xf]  ;;  %v2473_v34 = vor.u32 %v1754_v18, %v1671_v51  ;;  %v508_v51 = vunpack.c.l.b16 %v1952_v21  ;;  %v512_v21 = vunpack.c.l.b16 %v1967_v26  ;;  %v510_v26 = vunpack.c.l.b16 %v2161_v46 }
  0x32   :  { %v2429_v24 = vor.u32 %v1760_v35, %v1695_v25  ;;  %v1677_v35 = vld [vmem:[%s4235_s1 + $0x20] sm:$0xf] }
  0x33   :  { %446 = vmatpush.bf16.msrb.mxu2 %v2388_v61  ;;  %543 = vmatpush.bf16.msrb.mxu3 %v1950_v20  ;;  %v2469_v25 = vor.u32 %v1756_v17, %v1677_v35  ;;  %v1751_v35 = vld [vmem:[%s4235_s1 + $0x4] sm:$0xf]  ;;  %v1659_v17 = vld [vmem:[%s4235_s1 + $0xc] sm:$0xf0]  ;;  %v2502_v45 = vpack.c.b16 %v509_v30, %v508_v51 }
  0x34   :  { %397 = vmatpush.bf16.msrb.mxu1 %v2390_v42  ;;  %592 = vmatpush.bf16.msrb.mxu0 %v2390_v42  ;;  %v2498_v58 = vor.u32 %v1751_v35, %v1659_v17  ;;  %v4355_v35 = vld [vmem:[#allocation21_spill] sm:$0xff]  ;;  %v4370_v51 = vld [vmem:[#allocation24_spill] sm:$0xff] }
  0x35   :  { %1810 = vset.pattern.permute.xlu0 %v1840_v59  ;;  %358 = vmatmul.bf16.gmra.mxu0 %v2400_v50  ;;  %v2453_v59 = vor.u32 %v1757_v5, %v1683_v39  ;;  %v1665_v5 = vld [vmem:[%s4235_s1 + $0x8] sm:$0xf]  ;;  %v1753_v39 = vld [vmem:[%s4235_s1 + $0x10] sm:$0xf0]  ;;  %v518_v17 = vunpack.c.l.b16 %v4355_v35 }
  0x36   :  { %1005 = vperm.xlu2 %1809, %v1873_v1   ;;  %1001 = vperm.xlu1 %1808, %v1922_v13   ;;  %v2492_v18 = vor.u32 %v1753_v39, %v1665_v5  ;;  %v2512_v5 = vpack.c.b16 %v513_v22, %v512_v21  ;;  %v4356_v21 = vld [vmem:[#allocation22_spill] sm:$0xff] }
  0x37   :  { %997 = vperm.xlu0 %1810, %v1878_v2   ;;  %368 = vmatmul.bf16.gmra.mxu1 %v2410_v4  ;;  %v519_v22 = vunpack.c.l.b16 %v4356_v21  ;;  %v4359_v21 = vld [vmem:[#allocation4_spill] sm:$0xff] }
  0x38   :  { %378 = vmatmul.bf16.gmra.mxu2 %v2420_v33  ;;  %388 = vmatmul.bf16.gmra.mxu3 %v2422_v52 }
  0x39   :  { %447 = vmatpush.bf16.msrb.mxu2 %v2425_v53  ;;  %544 = vmatpush.bf16.msrb.mxu3 %v2017_v44 }
  0x3a   :  { %398 = vmatpush.bf16.msrb.mxu1 %v2429_v24  ;;  %593 = vmatpush.bf16.msrb.mxu0 %v2429_v24 }
  0x3d   :  { %448 = vmatpush.bf16.msrb.mxu2 %v2449_v40  ;;  %545 = vmatpush.bf16.msrb.mxu3 %v2044_v55 }
  0x3e   :  { %399 = vmatpush.bf16.msrb.mxu1 %v2453_v59  ;;  %594 = vmatpush.bf16.msrb.mxu0 %v2453_v59 }
  0x3f   :  { %1013 = vperm.xlu2 %1809, %v2015_v43   ;;  %1009 = vperm.xlu1 %1808, %v1917_v12  }
  0x40   :  { %1017 = vperm.xlu0 %1810, %v2004_v38  }
  0x41   :  { %449 = vmatpush.bf16.msrb.mxu2 %v2469_v25  ;;  %546 = vmatpush.bf16.msrb.mxu3 %v2101_v16 }
  0x42   :  { %400 = vmatpush.bf16.msrb.mxu1 %v2473_v34  ;;  %595 = vmatpush.bf16.msrb.mxu0 %v2473_v34 }
  0x45   :  { %450 = vmatpush.bf16.msrb.mxu2 %v2492_v18  ;;  %547 = vmatpush.bf16.msrb.mxu3 %v2133_v28 }
  0x46   :  { %401 = vmatpush.bf16.msrb.mxu1 %v2498_v58  ;;  %596 = vmatpush.bf16.msrb.mxu0 %v2498_v58 }
  0x47   :  { %1025 = vperm.xlu2 %1809, %v2099_v11   ;;  %1021 = vperm.xlu1 %1808, %v1999_v37  }
  0x48   :  { %1029 = vperm.xlu0 %1810, %v2070_v63   ;;  %451 = vmatmul.bf16.vlgmr.msrb.gmra.mxu2 %v2214_v56 }
  0x49   :  { %402 = vmatmul.bf16.vlgmr.msrb.gmra.mxu1 %v2214_v56  ;;  %548 = vmatmul.bf16.vlgmr.msrb.gmra.mxu3 %v2502_v45 }
  0x4a   :  { %597 = vmatmul.bf16.vlgmr.msrb.gmra.mxu0 %v2502_v45  ;;  %687 = vmatpush.bf16.msra.mxu2 %v1897_v7  ;;  %v511_v7 = vunpack.c.l.b16 %v2165_v47  ;;  %v516_v47 = vunpack.c.l.b16 %v1974_v29 }
  0x4b   :  { %736 = vmatpush.bf16.msra.mxu3 %v2258_v32  ;;  %638 = vmatpush.bf16.msra.mxu1 %v2251_v36  ;;  %v4348_v32 = vld [vmem:[#allocation2_spill] sm:$0xff] }
  0x4c   :  { %785 = vmatpush.bf16.msra.mxu0 %v2251_v36  ;;  %v515_v36 = vunpack.c.l.b16 %v2203_v23 }
  0x4e   :  { %688 = vmatpush.bf16.msra.mxu2 %v1904_v9  ;;  %v2532_v9 = vpack.c.b16 %v511_v7, %v510_v26  ;;  %v2682_v26 = vpack.c.b16 %v519_v22, %v518_v17  ;;  %v521_v22 = vunpack.c.l.b16 %v4359_v21 }
  0x4f   :  { %1037 = vperm.xlu2 %1809, %v2239_v31   ;;  %1033 = vperm.xlu1 %1808, %v2065_v62  }
  0x50   :  { %1041 = vperm.xlu0 %1810, %v2212_v57   ;;  %737 = vmatpush.bf16.msra.mxu3 %v2289_v54  ;;  %v1841_v54 = vmov 0  }
  0x51   :  { %639 = vmatpush.bf16.msra.mxu1 %v2287_v19  ;;  %786 = vmatpush.bf16.msra.mxu0 %v2287_v19 }
  0x52   :  { %689 = vmatpush.bf16.msra.mxu2 %v1931_v15  ;;  %v2543_v15 = vpack.c.b16 %v515_v36, %v514_v27 }
  0x54   :  { %738 = vmatpush.bf16.msra.mxu3 %v2340_v49 }
  0x55   :  { %640 = vmatpush.bf16.msra.mxu1 %v2338_v48  ;;  %787 = vmatpush.bf16.msra.mxu0 %v2338_v48 }
  0x56   :  { %690 = vmatpush.bf16.msra.mxu2 %v1950_v20 }
  0x57   :  { %1049 = vperm.xlu2 %1809, %v2336_v41   ;;  %1045 = vperm.xlu1 %1808, %v2189_v0  }
  0x58   :  { %1811 = vset.pattern.permute.xlu0 %v1841_v54  ;;  %456 = vmatmul.bf16.gmra.mxu2 %v2400_v50 }
  0x59   :  { %407 = vmatmul.bf16.gmra.mxu1 %v2400_v50  ;;  %553 = vmatmul.bf16.gmra.mxu3 %v2532_v9 }
  0x5a   :  { %602 = vmatmul.bf16.gmra.mxu0 %v2532_v9  ;;  %1108 = vperm.xlu0 %1811, %v1883_v3  }
  0x5b   :  { %739 = vmatpush.bf16.msra.mxu3 %v2390_v42  ;;  %641 = vmatpush.bf16.msra.mxu1 %v2388_v61  ;;  %v517_v42 = vunpack.c.l.b16 %v4348_v32  ;;  %v4357_v32 = vld [vmem:[#allocation13_spill] sm:$0xff] }
  0x5c   :  { %v2551_v20 = vpop.permute.xlu2 %930  ;;  %788 = vmatpush.bf16.msra.mxu0 %v2388_v61  ;;  %691 = vmatpush.bf16.msra.mxu2 %v2017_v44  ;;  %v1842_v61 = vmov 4  }
  0x5d   :  { %v2620_v30 = vpack.c.b16 %v517_v42, %v516_v47  ;;  %v129_v42 = vunpack.c.l.bf16 %v4357_v32  ;;  %v4360_v32 = vld [vmem:[#allocation14_spill] sm:$0xff] }
  0x5f   :  { %1813 = vset.pattern.permute.xlu2 %v1841_v54  ;;  %1812 = vset.pattern.permute.xlu1 %v1841_v54 }
  0x60   :  { %1116 = vperm.xlu2 %1813, %v1878_v2   ;;  %1112 = vperm.xlu1 %1812, %v1929_v14  }
  0x61   :  { %740 = vmatpush.bf16.msra.mxu3 %v2429_v24  ;;  %642 = vmatpush.bf16.msra.mxu1 %v2425_v53 }
  0x62   :  { %1128 = vperm.xlu0 %1811, %v1917_v12   ;;  %789 = vmatpush.bf16.msra.mxu0 %v2425_v53 }
  0x63   :  { %692 = vmatpush.bf16.msra.mxu2 %v2044_v55 }
  0x65   :  { %v2564_v56 = vpop.permute.xlu2 %935  ;;  %741 = vmatpush.bf16.msra.mxu3 %v2453_v59  ;;  %643 = vmatpush.bf16.msra.mxu1 %v2449_v40  ;;  %v4364_v59 = vld [vmem:[#allocation6_spill] sm:$0xff] }
  0x66   :  { %790 = vmatpush.bf16.msra.mxu0 %v2449_v40 }
  0x67   :  { %693 = vmatpush.bf16.msra.mxu2 %v2101_v16  ;;  %v2604_v16 = vld [vmem:[%s4237_s0] sm:$0x7] }
  0x68   :  { %461 = vmatmul.bf16.gmra.mxu2 %v2241_v10  ;;  %1124 = vperm.xlu2 %1813, %v1873_v1   ;;  %vm900_vm0 = vcmp.eq.s32.totalorder %v2604_v16, 1  ;;  %vm899_vm4 = vcmp.eq.s32.totalorder %v2604_v16, 0 }
  0x69   :  { %412 = vmatmul.bf16.gmra.mxu1 %v2241_v10  ;;  %558 = vmatmul.bf16.gmra.mxu3 %v2512_v5  ;;  %v901_v46 = vsel %vm900_vm0, 1, %v1841_v54 }
  0x6a   :  { %607 = vmatmul.bf16.gmra.mxu0 %v2512_v5  ;;  %1120 = vperm.xlu1 %1812, %v1922_v13   ;;  %v902_v48 = vperm.slane %v901_v46, 0  ;;  %v903_v49 = vperm.slane %v901_v46, 1 }
  0x6b   :  { %1140 = vperm.xlu0 %1811, %v1999_v37   ;;  %742 = vmatpush.bf16.msra.mxu3 %v2473_v34 }
  0x6c   :  { %644 = vmatpush.bf16.msra.mxu1 %v2469_v25  ;;  %791 = vmatpush.bf16.msra.mxu0 %v2469_v25  ;;  %vm2629_vm1 = vcmp.eq.s32.totalorder %v902_v48, 1  ;;  %vm2633_vm2 = vcmp.eq.s32.totalorder %v903_v49, 1  ;;  %v4358_v48 = vld [vmem:[#allocation3_spill] sm:$0xff] }
  0x6d   :  { %v2580_v44 = vpop.permute.xlu2 %950  ;;  %694 = vmatpush.bf16.msra.mxu2 %v2133_v28  ;;  %v520_v49 = vunpack.c.l.b16 %v4358_v48  ;;  %v130_v48 = vunpack.c.l.bf16 %v4360_v32  ;;  %v4363_v32 = vld [vmem:[#allocation5_spill] sm:$0xff] }
  0x6f   :  { %743 = vmatpush.bf16.msra.mxu3 %v2498_v58  ;;  %v904_v58 = vperm.slane %v901_v46, 2  ;;  %v2750_v21 = vpack.c.b16 %v521_v22, %v520_v49  ;;  %v146_v40 = vsub.f32 %v4364_v59, %v130_v48  ;;  %v1843_v48 = vmov 5   ;;  %v4369_v59 = vld [vmem:[#allocation23_spill] sm:$0xff] }
  0x70   :  { %1136 = vperm.xlu2 %1813, %v2004_v38   ;;  %645 = vmatpush.bf16.msra.mxu1 %v2492_v18 }
  0x71   :  { %792 = vmatpush.bf16.msra.mxu0 %v2492_v18  ;;  %vm2637_vm3 = vcmp.eq.s32.totalorder %v904_v58, 1  ;;  %4362 = vst [vmem:[#allocation21_spill] sm:$0xff] %v2750_v21  ;;  %v522_v58 = vunpack.c.l.b16 %v4369_v59 }
  0x72   :  { %1132 = vperm.xlu1 %1812, %v2015_v43  }
  0x73   :  { %1152 = vperm.xlu0 %1811, %v2065_v62  }
  0x75   :  { %v2589_v55 = vpop.permute.xlu1 %920  ;;  %v2591_v60 = vpop.permute.xlu0 %910 }
  0x76   :  { %v2593_v10 = vpop.permute.xlu2 %965 }
  0x78   :  { %466 = vmatmul.bf16.gmra.mxu2 %v2410_v4  ;;  %1148 = vperm.xlu2 %1813, %v2070_v63  }
  0x79   :  { %417 = vmatmul.bf16.gmra.mxu1 %v2410_v4  ;;  %563 = vmatmul.bf16.gmra.mxu3 %v2543_v15 }
  0x7a   :  { %612 = vmatmul.bf16.gmra.mxu0 %v2543_v15  ;;  %1144 = vperm.xlu1 %1812, %v2099_v11  }
  0x7b   :  { %1164 = vperm.xlu0 %1811, %v2189_v0  }
  0x7d   :  { %v2607_v19 = vpop.permute.xlu1 %925 }
  0x7e   :  { %v2610_v23 = vpop.permute.xlu0 %915  ;;  %v2612_v28 = vpop.permute.xlu2 %980 }
  0x80   :  { %1160 = vperm.xlu2 %1813, %v2212_v57  }
  0x82   :  { %1156 = vperm.xlu1 %1812, %v2239_v31  }
  0x83   :  { %1815 = vset.pattern.permute.xlu0 %v1842_v61 }
  0x84   :  { %1224 = vperm.xlu0 %1815, %v1929_v14  }
  0x85   :  { %v2622_v50 = vpop.permute.xlu1 %945 }
  0x86   :  { %v2624_v4 = vpop.permute.xlu0 %940 }
  0x88   :  { %471 = vmatmul.bf16.gmra.mxu2 %v2243_v8  ;;  %1814 = vset.pattern.permute.xlu2 %v1842_v61  ;;  %v2627_v29 = vpop.permute.xlu2 %993 }
  0x89   :  { %422 = vmatmul.bf16.gmra.mxu1 %v2243_v8  ;;  %568 = vmatmul.bf16.gmra.mxu3 %v2620_v30 }
  0x8a   :  { %617 = vmatmul.bf16.gmra.mxu0 %v2620_v30  ;;  %1168 = vperm.xlu1 %1812, %v2336_v41  }
  0x8b   :  { %1220 = vperm.xlu2 %1814, %v1883_v3   ;;  %v523_v3 = vunpack.c.l.b16 %v4370_v51 }
  0x8c   :  { %1244 = vperm.xlu0 %1815, %v2015_v43  }
  0x8d   :  { %v2659_v8 = vpop.permute.xlu1 %960 }
  0x8e   :  { %v2661_v34 = vpop.permute.xlu0 %955 }
  0x90   :  { %v2663_v39 = vpop.permute.xlu2 %1005 }
  0x92   :  { %1816 = vset.pattern.permute.xlu1 %v1842_v61 }
  0x93   :  { %1232 = vperm.xlu2 %1814, %v1922_v13   ;;  %1228 = vperm.xlu1 %1816, %v1878_v2  }
  0x94   :  { %1256 = vperm.xlu0 %1815, %v2099_v11  }
  0x95   :  { %v2684_v7 = vpop.permute.xlu1 %975 }
  0x96   :  { %v2686_v27 = vpop.permute.xlu0 %970 }
  0x98   :  { %476 = vmatmul.bf16.gmra.mxu2 %v2420_v33 }
  0x99   :  { %427 = vmatmul.bf16.gmra.mxu1 %v2420_v33  ;;  %573 = vmatmul.bf16.gmra.mxu3 %v2682_v26  ;;  %v2691_v36 = vpop.permute.xlu2 %1013  ;;  %v145_v33 = vsub.f32 %v4363_v32, %v129_v42 }
  0x9a   :  { %622 = vmatmul.bf16.gmra.mxu0 %v2682_v26 }
  0x9b   :  { %1240 = vperm.xlu2 %1814, %v1917_v12   ;;  %1236 = vperm.xlu1 %1816, %v1873_v1   ;;  %v2759_v13 = vpack.c.bf16 %v146_v40, %v145_v33 }
  0x9c   :  { %1268 = vperm.xlu0 %1815, %v2239_v31  }
  0x9f   :  { %v2709_v47 = vpop.permute.xlu0 %985 }
  0xa0   :  { %v2712_v61 = vpop.permute.xlu1 %989 }
  0xa1   :  { %v2727_v35 = vpop.permute.xlu2 %1025  ;;  %v2729_v17 = vpop.f32.mrf.mxu0 }
  0xa2   :  { %v2745_v25 = vpop.f32.mrf.mxu1 }
  0xa3   :  { %4361 = vst [vmem:[#allocation2_spill] sm:$0xff] %v2745_v25  ;;  %1252 = vperm.xlu2 %1814, %v1999_v37   ;;  %1248 = vperm.xlu1 %1816, %v2004_v38   ;;  %v4385_v25 = vsel %vm2629_vm1, %v2551_v20, %v2663_v39 }
  0xa4   :  { %1280 = vperm.xlu0 %1815, %v2336_v41  }
  0xa8   :  { %481 = vmatmul.bf16.gmra.mxu2 %v2249_v6  ;;  %v2755_v46 = vpop.permute.xlu1 %1001  ;;  %v2757_v12 = vpop.f32.mrf.mxu2 }
  0xa9   :  { %4365 = vst [vmem:[#allocation22_spill] sm:$0xff] %v2757_v12  ;;  %432 = vmatmul.bf16.gmra.mxu1 %v2249_v6  ;;  %578 = vmatmul.bf16.gmra.mxu3 %v2750_v21  ;;  %v998_v33 = vpop.permute.xlu0 %997  ;;  %v2775_v42 = vpop.permute.xlu2 %1037 }
  0xaa   :  { %627 = vmatmul.bf16.gmra.mxu0 %v2750_v21  ;;  %v1058_v6 = vsel %vm2629_vm1, %v2589_v55, %v998_v33  ;;  %v1059_v49 = vsel %vm2633_vm2, %v2589_v55, %v998_v33  ;;  %v1060_v22 = vsel %vm2637_vm3, %v2589_v55, %v998_v33  ;;  %v2791_v32 = vpop.f32.mrf.mxu3  ;;  %v2793_v40 = vpop.f32.mrf.mxu0  ;;  %v1100_v55 = vsel %vm899_vm4, 1, %v1841_v54 }
  0xab   :  { %4366 = vst [vmem:[#allocation13_spill] sm:$0xff] %v2791_v32  ;;  %1264 = vperm.xlu2 %1814, %v2065_v62   ;;  %1260 = vperm.xlu1 %1816, %v2070_v63   ;;  %v2805_v33 = vpop.f32.mrf.mxu1  ;;  %v2853_v54 = vpack.c.b16 %v523_v3, %v522_v58  ;;  %v1101_v32 = vperm.slane %v1100_v55, 0  ;;  %v1102_v59 = vperm.slane %v1100_v55, 1 }
  0xac   :  { %4367 = vst [vmem:[#allocation3_spill] sm:$0xff] %v2805_v33  ;;  %1819 = vset.pattern.permute.xlu0 %v1843_v48  ;;  %v4389_v33 = vsel %vm2633_vm2, %v2551_v20, %v2663_v39 }
  0xad   :  { %1292 = vperm.xlu0 %1819, %v1878_v2   ;;  %4373 = vst [vmem:[#allocation6_spill] sm:$0xff] %v2853_v54  ;;  %vm2860_vm5 = vcmp.eq.s32.totalorder %v1101_v32, 1  ;;  %vm2864_vm6 = vcmp.eq.s32.totalorder %v1102_v59, 1 }
  0xb0   :  { %v2809_v62 = vpop.f32.mrf.mxu2 }
  0xb1   :  { %4368 = vst [vmem:[#allocation4_spill] sm:$0xff] %v2809_v62  ;;  %v2811_v37 = vpop.permute.xlu1 %1009  ;;  %v2813_v1 = vpop.permute.xlu2 %1049  ;;  %v1103_v62 = vperm.slane %v1100_v55, 2  ;;  %v2906_v55 = vld [vmem:[%s4234_s2 + $0x8] sm:$0xff] }
  0xb2   :  { %v2818_v18 = vpop.permute.xlu0 %1017  ;;  %v2824_v16 = vpop.f32.mrf.mxu3 }
  0xb3   :  { %4371 = vst [vmem:[#allocation14_spill] sm:$0xff] %v2824_v16  ;;  %1276 = vperm.xlu2 %1814, %v2189_v0   ;;  %1272 = vperm.xlu1 %1816, %v2212_v57   ;;  %v2840_v2 = vpop.f32.mrf.mxu0  ;;  %vm2868_vm7 = vcmp.eq.s32.totalorder %v1103_v62, 1 }
  0xb4   :  { %v2850_v16 = vpop.f32.mrf.mxu1 }
  0xb5   :  { %4372 = vst [vmem:[#allocation5_spill] sm:$0xff] %v2850_v16  ;;  %1312 = vperm.xlu0 %1819, %v2004_v38  }
  0xb8   :  { %486 = vmatmul.bf16.gmra.mxu2 %v2422_v52 }
  0xb9   :  { %437 = vmatmul.bf16.gmra.mxu1 %v2422_v52  ;;  %583 = vmatmul.bf16.gmra.mxu3 %v2853_v54  ;;  %v2858_v0 = vpop.permute.xlu1 %1021 }
  0xba   :  { %632 = vmatmul.bf16.gmra.mxu0 %v2853_v54  ;;  %v2873_v3 = vpop.permute.xlu0 %1029  ;;  %v1117_v52 = vpop.permute.xlu2 %1116 }
  0xbb   :  { %1818 = vset.pattern.permute.xlu2 %v1843_v48  ;;  %1817 = vset.pattern.permute.xlu1 %v1843_v48  ;;  %v2887_v62 = vpop.f32.mrf.mxu2  ;;  %v2889_v59 = vpop.f32.mrf.mxu3  ;;  %v2893_v48 = vsel %vm2860_vm5, %v1117_v52, %v1058_v6  ;;  %v2897_v58 = vsel %vm2864_vm6, %v1117_v52, %v1059_v49  ;;  %v2901_v32 = vsel %vm2868_vm7, %v1117_v52, %v1060_v22  ;;  %v1824_v6 = vld [vmem:[%s4234_s2] sm:$0xff] }
  0xbc   :  { %4380 = vst [vmem:[#allocation23_spill] sm:$0xff] %v2887_v62  ;;  %1288 = vperm.xlu2 %1818, %v2906_v55   ;;  %1284 = vperm.xlu1 %1817, %v1824_v6   ;;  %v2915_v49 = vpop.f32.mrf.mxu0 }
  0xbd   :  { %4381 = vst [vmem:[#allocation24_spill] sm:$0xff] %v2889_v59  ;;  %v2912_v59 = vpop.f32.mrf.mxu1  ;;  %1324 = vperm.xlu0 %1819, %v2070_v63  }
  0xbe   :  { %4382 = vst [vmem:[#allocation41_spill] sm:$0xff] %v2893_v48 }
  0xbf   :  { %4383 = vst [vmem:[#allocation42_spill] sm:$0xff] %v2897_v58 }
  0xc0   :  { %4384 = vst [vmem:[#allocation43_spill] sm:$0xff] %v2901_v32  ;;  %v4391_v32 = vsel %vm2637_vm3, %v2551_v20, %v2663_v39 }
  0xc1   :  { %v2917_v22 = vpop.permute.xlu1 %1033 }
  0xc2   :  { %v2919_v52 = vpop.permute.xlu0 %1041  ;;  %v1125_v62 = vpop.permute.xlu2 %1124 }
  0xc3   :  { %v2940_v58 = vsel %vm2860_vm5, %v1125_v62, %v4385_v25  ;;  %v2942_v16 = vpop.f32.mrf.mxu2  ;;  %v2944_v48 = vpop.f32.mrf.mxu3  ;;  %v2953_v63 = vsel %vm2864_vm6, %v1125_v62, %v4389_v33  ;;  %v2962_v25 = vsel %vm2868_vm7, %v1125_v62, %v4391_v32  ;;  %v2973_v33 = vld [vmem:[%s4234_s2 + $0x18] sm:$0xff] }
  0xc4   :  { %4386 = vst [vmem:[#allocation44_spill] sm:$0xff] %v2940_v58  ;;  %1296 = vperm.xlu1 %1817, %v2973_v33   ;;  %v4401_v58 = vld [vmem:[#allocation33_spill] sm:$0xff] }
  0xc5   :  { %4387 = vst [vmem:[#allocation45_spill] sm:$0xff] %v2942_v16  ;;  %1336 = vperm.xlu0 %1819, %v2212_v57   ;;  %v4394_v57 = vsel %vm2629_vm1, %v2622_v50, %v2818_v18 }
  0xc6   :  { %4388 = vst [vmem:[#allocation46_spill] sm:$0xff] %v2944_v48  ;;  %v2967_v48 = vld [vmem:[%s4234_s2 + $0x20] sm:$0xff]  ;;  %v403_v20 = vpop.f32.mrf.mxu1 }
  0xc7   :  { %4390 = vst [vmem:[#allocation47_spill] sm:$0xff] %v2953_v63  ;;  %1300 = vperm.xlu2 %1818, %v2967_v48   ;;  %v598_v39 = vpop.f32.mrf.mxu0 }
  0xc8   :  { %4392 = vst [vmem:[#allocation48_spill] sm:$0xff] %v2962_v25  ;;  %v2977_v32 = vadd.f32 %v598_v39, %v403_v20  ;;  %695 = vmatmul.bf16.vlgmr.msra.gmra.mxu2 %v2759_v13  ;;  %v131_v25 = vunpack.c.l.bf16 %v4401_v58 }
  0xc9   :  { %646 = vmatmul.bf16.vlgmr.msra.gmra.mxu1 %v2502_v45  ;;  %744 = vmatmul.bf16.vlgmr.msra.gmra.mxu3 %v2759_v13  ;;  %v2982_v62 = vpop.permute.xlu1 %1045  ;;  %v4396_v45 = vsel %vm2633_vm2, %v2622_v50, %v2818_v18 }
  0xca   :  { %4393 = vst [vmem:[#allocation49_spill] sm:$0xff] %v2977_v32  ;;  %793 = vmatmul.bf16.vlgmr.msra.gmra.mxu0 %v2759_v13  ;;  %v1137_v16 = vpop.permute.xlu2 %1136  ;;  %v4398_v13 = vsel %vm2637_vm3, %v2622_v50, %v2818_v18  ;;  %v4402_v32 = vld [vmem:[#allocation34_spill] sm:$0xff]  ;;  %v4279_v50 = vmov 3   ;;  %v4403_v18 = vsel %vm2629_vm1, %v2591_v60, %v2712_v61 }
  0xcb   :  { %v2992_v20 = vsel %vm2860_vm5, %v1137_v16, %v4394_v57  ;;  %v3001_v39 = vsel %vm2864_vm6, %v1137_v16, %v4396_v45  ;;  %v3010_v63 = vsel %vm2868_vm7, %v1137_v16, %v4398_v13  ;;  %v3012_v57 = vpop.f32.mrf.mxu2  ;;  %v132_v54 = vunpack.c.l.bf16 %v4402_v32 }
  0xcc   :  { %4395 = vst [vmem:[#allocation50_spill] sm:$0xff] %v2992_v20  ;;  %v1827_v20 = vld [vmem:[%s4234_s2 + $0x28] sm:$0xff]  ;;  %v1109_v45 = vpop.permute.xlu0 %1108  ;;  %v4405_v16 = vsel %vm2633_vm2, %v2591_v60, %v2712_v61  ;;  %v4407_v32 = vsel %vm2637_vm3, %v2591_v60, %v2712_v61  ;;  %v1067_v60 = vsel %vm2629_vm1, %v2564_v56, %v2811_v37  ;;  %v1068_v61 = vsel %vm2633_vm2, %v2564_v56, %v2811_v37 }
  0xcd   :  { %4397 = vst [vmem:[#allocation51_spill] sm:$0xff] %v3001_v39  ;;  %1304 = vperm.xlu1 %1817, %v1827_v20   ;;  %v549_v39 = vpop.f32.mrf.mxu3  ;;  %1820 = vset.pattern.permute.xlu0 %v4279_v50  ;;  %v3037_v58 = vsel %vm2864_vm6, %v1109_v45, %v4405_v16  ;;  %v3046_v13 = vsel %vm2868_vm7, %v1109_v45, %v4407_v32 }
  0xce   :  { %4399 = vst [vmem:[#allocation52_spill] sm:$0xff] %v3010_v63  ;;  %1396 = vperm.xlu0 %1820, %v1824_v6   ;;  %v405_v50 = vpop.f32.mrf.mxu1 }
  0xcf   :  { %4400 = vst [vmem:[#allocation53_spill] sm:$0xff] %v3012_v57  ;;  %1308 = vperm.xlu2 %1818, %v2015_v43   ;;  %v3028_v43 = vsel %vm2860_vm5, %v1109_v45, %v4403_v18  ;;  %v3049_v18 = vadd.f32 %v549_v39, %v2729_v17  ;;  %v600_v63 = vpop.f32.mrf.mxu0  ;;  %v4408_v57 = vld [vmem:[#allocation25_spill] sm:$0xff]  ;;  %v1069_v17 = vsel %vm2637_vm3, %v2564_v56, %v2811_v37 }
  0xd0   :  { %4404 = vst [vmem:[#allocation33_spill] sm:$0xff] %v3028_v43  ;;  %v3051_v43 = vadd.f32 %v600_v63, %v405_v50  ;;  %v147_v16 = vsub.f32 %v4408_v57, %v131_v25  ;;  %v4412_v39 = vsel %vm2633_vm2, %v2659_v8, %v2873_v3  ;;  %v4414_v56 = vsel %vm2637_vm3, %v2659_v8, %v2873_v3 }
  0xd1   :  { %4406 = vst [vmem:[#allocation34_spill] sm:$0xff] %v3037_v58  ;;  %v4409_v58 = vld [vmem:[#allocation26_spill] sm:$0xff]  ;;  %v4416_v45 = vsel %vm2629_vm1, %v2610_v23, %v2627_v29 }
  0xd2   :  { %v148_v21 = vsub.f32 %v4409_v58, %v132_v54  ;;  %v1149_v6 = vpop.permute.xlu2 %1148  ;;  %v1113_v63 = vpop.permute.xlu1 %1112  ;;  %v4410_v54 = vsel %vm2629_vm1, %v2659_v8, %v2873_v3  ;;  %v1828_v8 = vld [vmem:[%s4234_s2 + $0x40] sm:$0xff]  ;;  %v4417_v3 = vsel %vm2633_vm2, %v2610_v23, %v2627_v29 }
  0xd3   :  { %v3074_v25 = vsel %vm2860_vm5, %v1149_v6, %v4410_v54  ;;  %v3083_v57 = vsel %vm2864_vm6, %v1149_v6, %v4412_v39  ;;  %v3092_v37 = vsel %vm2868_vm7, %v1149_v6, %v4414_v56  ;;  %v3101_v50 = vsel %vm2860_vm5, %v1113_v63, %v4416_v45  ;;  %v3103_v58 = vpop.f32.mrf.mxu2 }
  0xd4   :  { %4411 = vst [vmem:[#allocation25_spill] sm:$0xff] %v3074_v25  ;;  %v3116_v32 = vsel %vm2864_vm6, %v1113_v63, %v4417_v3  ;;  %v4418_v6 = vsel %vm2637_vm3, %v2610_v23, %v2627_v29  ;;  %v1129_v54 = vpop.permute.xlu0 %1128  ;;  %v162_v56 = vpack.c.bf16 %v148_v21, %v147_v16  ;;  %v1076_v16 = vsel %vm2629_vm1, %v2580_v44, %v2858_v0 }
  0xd5   :  { %4413 = vst [vmem:[#allocation26_spill] sm:$0xff] %v3083_v57  ;;  %1316 = vperm.xlu1 %1817, %v1828_v8   ;;  %v551_v39 = vpop.f32.mrf.mxu3  ;;  %v3129_v45 = vsel %vm2860_vm5, %v1129_v54, %v1067_v60  ;;  %v3133_v3 = vsel %vm2864_vm6, %v1129_v54, %v1068_v61  ;;  %v3137_v57 = vsel %vm2868_vm7, %v1129_v54, %v1069_v17 }
  0xd6   :  { %4415 = vst [vmem:[#allocation54_spill] sm:$0xff] %v3092_v37  ;;  %v3140_v23 = vadd.f32 %v551_v39, %v2793_v40  ;;  %1416 = vperm.xlu0 %1820, %v1827_v20   ;;  %v408_v29 = vpop.f32.mrf.mxu1  ;;  %v4420_v40 = vsel %vm2629_vm1, %v2684_v7, %v2919_v52  ;;  %v4424_v61 = vsel %vm2637_vm3, %v2684_v7, %v2919_v52 }
  0xd7   :  { %1320 = vperm.xlu2 %1818, %v2099_v11   ;;  %v3125_v11 = vsel %vm2868_vm7, %v1113_v63, %v4418_v6  ;;  %4419 = vst [vmem:[#allocation55_spill] sm:$0xff] %v3133_v3  ;;  %v603_v63 = vpop.f32.mrf.mxu0  ;;  %v1077_v39 = vsel %vm2633_vm2, %v2580_v44, %v2858_v0 }
  0xd8   :  { %v3142_v6 = vadd.f32 %v603_v63, %v408_v29  ;;  %700 = vmatmul.bf16.gmra.mxu2 %v162_v56  ;;  %v4426_v63 = vld [vmem:[#allocation15_spill] sm:$0xff] }
  0xd9   :  { %651 = vmatmul.bf16.gmra.mxu1 %v2532_v9  ;;  %749 = vmatmul.bf16.gmra.mxu3 %v162_v56  ;;  %v4422_v9 = vsel %vm2633_vm2, %v2684_v7, %v2919_v52  ;;  %v1829_v7 = vld [vmem:[%s4234_s2 + $0x58] sm:$0xff] }
  0xda   :  { %798 = vmatmul.bf16.gmra.mxu0 %v162_v56  ;;  %v1161_v21 = vpop.permute.xlu2 %1160  ;;  %v1078_v56 = vsel %vm2637_vm3, %v2580_v44, %v2858_v0 }
  0xdb   :  { %v3156_v20 = vsel %vm2860_vm5, %v1161_v21, %v4420_v40  ;;  %v3165_v60 = vsel %vm2864_vm6, %v1161_v21, %v4422_v9  ;;  %v3174_v17 = vsel %vm2868_vm7, %v1161_v21, %v4424_v61  ;;  %v3176_v54 = vpop.f32.mrf.mxu2  ;;  %v133_v21 = vunpack.c.l.bf16 %v4426_v63  ;;  %v4427_v40 = vld [vmem:[#allocation16_spill] sm:$0xff] }
  0xdc   :  { %4421 = vst [vmem:[#allocation56_spill] sm:$0xff] %v3156_v20  ;;  %v1121_v52 = vpop.permute.xlu1 %1120  ;;  %v134_v9 = vunpack.c.l.bf16 %v4427_v40  ;;  %v4428_v61 = vsel %vm2629_vm1, %v2607_v19, %v2755_v46  ;;  %v4430_v63 = vsel %vm2637_vm3, %v2607_v19, %v2755_v46 }
  0xdd   :  { %4423 = vst [vmem:[#allocation57_spill] sm:$0xff] %v3165_v60  ;;  %1328 = vperm.xlu1 %1817, %v1829_v7   ;;  %v554_v29 = vpop.f32.mrf.mxu3  ;;  %v3199_v44 = vsel %vm2860_vm5, %v1121_v52, %v4428_v61  ;;  %v3217_v40 = vsel %vm2868_vm7, %v1121_v52, %v4430_v63  ;;  %v1141_v61 = vpop.permute.xlu0 %1140  ;;  %v4434_v63 = vld [vmem:[#allocation7_spill] sm:$0xff] }
  0xde   :  { %4425 = vst [vmem:[#allocation58_spill] sm:$0xff] %v3174_v17  ;;  %v3220_v60 = vadd.f32 %v554_v29, %v2840_v2  ;;  %v3224_v20 = vsel %vm2860_vm5, %v1141_v61, %v1076_v16  ;;  %v3232_v17 = vsel %vm2868_vm7, %v1141_v61, %v1078_v56  ;;  %1428 = vperm.xlu0 %1820, %v1828_v8   ;;  %v4435_v29 = vld [vmem:[#allocation8_spill] sm:$0xff] }
  0xdf   :  { %1332 = vperm.xlu2 %1818, %v2239_v31   ;;  %v4429_v31 = vsel %vm2633_vm2, %v2607_v19, %v2755_v46  ;;  %4431 = vst [vmem:[#allocation15_spill] sm:$0xff] %v3224_v20  ;;  %v410_v19 = vpop.f32.mrf.mxu1  ;;  %v605_v46 = vpop.f32.mrf.mxu0  ;;  %v149_v2 = vsub.f32 %v4434_v63, %v133_v21  ;;  %v150_v25 = vsub.f32 %v4435_v29, %v134_v9  ;;  %v1830_v21 = vld [vmem:[%s4234_s2 + $0x70] sm:$0xff] }
  0xe0   :  { %v3208_v0 = vsel %vm2864_vm6, %v1121_v52, %v4429_v31  ;;  %v3228_v31 = vsel %vm2864_vm6, %v1141_v61, %v1077_v39  ;;  %4433 = vst [vmem:[#allocation59_spill] sm:$0xff] %v3232_v17  ;;  %v3234_v52 = vadd.f32 %v605_v46, %v410_v19  ;;  %v1085_v16 = vsel %vm2629_vm1, %v2593_v10, %v2917_v22 }
  0xe1   :  { %4432 = vst [vmem:[#allocation16_spill] sm:$0xff] %v3228_v31  ;;  %v1086_v8 = vsel %vm2633_vm2, %v2593_v10, %v2917_v22  ;;  %v1087_v56 = vsel %vm2637_vm3, %v2593_v10, %v2917_v22  ;;  %v163_v19 = vpack.c.bf16 %v150_v25, %v149_v2  ;;  %v4436_v46 = vsel %vm2629_vm1, %v2624_v4, %v2691_v36 }
  0xe2   :  { %v4440_v22 = vsel %vm2637_vm3, %v2624_v4, %v2691_v36 }
  0xe3   :  { %v3242_v39 = vpop.f32.mrf.mxu2 }
  0xe4   :  { %v1133_v9 = vpop.permute.xlu1 %1132 }
  0xe5   :  { %1340 = vperm.xlu1 %1817, %v1830_v21   ;;  %v556_v61 = vpop.f32.mrf.mxu3  ;;  %v3263_v63 = vsel %vm2860_vm5, %v1133_v9, %v4436_v46  ;;  %v3281_v25 = vsel %vm2868_vm7, %v1133_v9, %v4440_v22  ;;  %v1153_v2 = vpop.permute.xlu0 %1152 }
  0xe6   :  { %4437 = vst [vmem:[#allocation7_spill] sm:$0xff] %v3263_v63  ;;  %v3284_v29 = vadd.f32 %v556_v61, %v2915_v49  ;;  %v3286_v46 = vpop.permute.xlu2 %1220  ;;  %v3290_v37 = vsel %vm2860_vm5, %v1153_v2, %v1085_v16  ;;  %1440 = vperm.xlu0 %1820, %v1829_v7   ;;  %v1094_v16 = vsel %vm2629_vm1, %v2612_v28, %v2982_v62  ;;  %v4446_v61 = vld [vmem:[#allocation35_spill] sm:$0xff]  ;;  %v4505_v63 = vld [vmem:[#allocation12_spill] sm:$0xff] }
  0xe7   :  { %1344 = vperm.xlu2 %1818, %v2336_v41   ;;  %v4438_v41 = vsel %vm2633_vm2, %v2624_v4, %v2691_v36  ;;  %4441 = vst [vmem:[#allocation60_spill] sm:$0xff] %v3281_v25  ;;  %v3298_v4 = vsel %vm2868_vm7, %v1153_v2, %v1087_v56  ;;  %v413_v36 = vpop.f32.mrf.mxu1  ;;  %v1095_v7 = vsel %vm2633_vm2, %v2612_v28, %v2982_v62 }
  0xe8   :  { %v3272_v10 = vsel %vm2864_vm6, %v1133_v9, %v4438_v41  ;;  %4442 = vst [vmem:[#allocation61_spill] sm:$0xff] %v3290_v37  ;;  %v3294_v41 = vsel %vm2864_vm6, %v1153_v2, %v1086_v8  ;;  %v608_v9 = vpop.f32.mrf.mxu0  ;;  %705 = vmatmul.bf16.gmra.mxu2 %v163_v19  ;;  %v4445_v8 = vmov 3   ;;  %v4447_v2 = vld [vmem:[#allocation36_spill] sm:$0xff] }
  0xe9   :  { %4439 = vst [vmem:[#allocation8_spill] sm:$0xff] %v3272_v10  ;;  %v3300_v22 = vadd.f32 %v608_v9, %v413_v36  ;;  %656 = vmatmul.bf16.gmra.mxu1 %v2512_v5  ;;  %754 = vmatmul.bf16.gmra.mxu3 %v163_v19  ;;  %v136_v36 = vunpack.c.l.bf16 %v4447_v2  ;;  %v1096_v9 = vsel %vm2637_vm3, %v2612_v28, %v2982_v62  ;;  %v1831_v37 = vld [vmem:[%s4234_s2 + $0x10] sm:$0xff] }
  0xea   :  { %4443 = vst [vmem:[#allocation62_spill] sm:$0xff] %v3294_v41  ;;  %803 = vmatmul.bf16.gmra.mxu0 %v163_v19  ;;  %v135_v19 = vunpack.c.l.bf16 %v4446_v61  ;;  %v4448_v41 = vsel %vm2629_vm1, %v2661_v34, %v2727_v35  ;;  %v4450_v61 = vsel %vm2633_vm2, %v2661_v34, %v2727_v35  ;;  %v4452_v28 = vsel %vm2637_vm3, %v2661_v34, %v2727_v35 }
  0xeb   :  { %4444 = vst [vmem:[#allocation63_spill] sm:$0xff] %v3298_v4  ;;  %v3303_v49 = vpop.f32.mrf.mxu2 }
  0xec   :  { %v1145_v56 = vpop.permute.xlu1 %1144 }
  0xed   :  { %1821 = vset.pattern.permute.xlu1 %v4445_v8  ;;  %v3315_v5 = vpop.f32.mrf.mxu3  ;;  %v3339_v2 = vsel %vm2864_vm6, %v1145_v56, %v4450_v61  ;;  %v3348_v62 = vsel %vm2868_vm7, %v1145_v56, %v4452_v28  ;;  %v4457_v28 = vld [vmem:[#allocation27_spill] sm:$0xff] }
  0xee   :  { %4451 = vst [vmem:[#allocation36_spill] sm:$0xff] %v3339_v2  ;;  %v3353_v4 = vpop.permute.xlu2 %1232  ;;  %1400 = vperm.xlu1 %1821, %v2906_v55   ;;  %1452 = vperm.xlu0 %1820, %v1830_v21   ;;  %v4459_v55 = vsel %vm2629_vm1, %v2686_v27, %v2775_v42 }
  0xef   :  { %1822 = vset.pattern.permute.xlu2 %v4445_v8  ;;  %v3330_v8 = vsel %vm2860_vm5, %v1145_v56, %v4448_v41  ;;  %4453 = vst [vmem:[#allocation64_spill] sm:$0xff] %v3348_v62  ;;  %v1165_v41 = vpop.permute.xlu0 %1164  ;;  %v415_v35 = vpop.f32.mrf.mxu1  ;;  %v4458_v62 = vld [vmem:[#allocation28_spill] sm:$0xff] }
  0xf0   :  { %4449 = vst [vmem:[#allocation35_spill] sm:$0xff] %v3330_v8  ;;  %1404 = vperm.xlu2 %1822, %v1831_v37   ;;  %v3357_v61 = vsel %vm2860_vm5, %v1165_v41, %v1094_v16  ;;  %v3361_v2 = vsel %vm2864_vm6, %v1165_v41, %v1095_v7  ;;  %v3365_v34 = vsel %vm2868_vm7, %v1165_v41, %v1096_v9  ;;  %v610_v56 = vpop.f32.mrf.mxu0 }
  0xf1   :  { %4454 = vst [vmem:[#allocation65_spill] sm:$0xff] %v3357_v61  ;;  %v3368_v37 = vadd.f32 %v610_v56, %v415_v35  ;;  %v151_v8 = vsub.f32 %v4457_v28, %v135_v19  ;;  %v152_v16 = vsub.f32 %v4458_v62, %v136_v36  ;;  %v4461_v19 = vsel %vm2633_vm2, %v2686_v27, %v2775_v42 }
  0xf2   :  { %4455 = vst [vmem:[#allocation66_spill] sm:$0xff] %v3361_v2  ;;  %v4463_v9 = vsel %vm2637_vm3, %v2686_v27, %v2775_v42 }
  0xf3   :  { %4456 = vst [vmem:[#allocation67_spill] sm:$0xff] %v3365_v34  ;;  %v3372_v61 = vpop.f32.mrf.mxu2  ;;  %v164_v2 = vpack.c.bf16 %v152_v16, %v151_v8 }
  0xf4   :  { %v1157_v31 = vpop.permute.xlu1 %1156 }
  0xf5   :  { %v3374_v7 = vpop.f32.mrf.mxu3  ;;  %v3383_v21 = vsel %vm2860_vm5, %v1157_v31, %v4459_v55  ;;  %v3392_v36 = vsel %vm2864_vm6, %v1157_v31, %v4461_v19  ;;  %v3401_v8 = vsel %vm2868_vm7, %v1157_v31, %v4463_v9  ;;  %v4468_v55 = vld [vmem:[#allocation18_spill] sm:$0xff]  ;;  %v4469_v19 = vsel %vm2629_vm1, %v2709_v47, %v2813_v1 }
  0xf6   :  { %4460 = vst [vmem:[#allocation27_spill] sm:$0xff] %v3383_v21  ;;  %v3404_v62 = vpop.permute.xlu2 %1240  ;;  %1408 = vperm.xlu1 %1821, %v2973_v33   ;;  %v138_v33 = vunpack.c.l.bf16 %v4468_v55 }
  0xf7   :  { %4462 = vst [vmem:[#allocation28_spill] sm:$0xff] %v3392_v36  ;;  %v418_v41 = vpop.f32.mrf.mxu1  ;;  %v3407_v35 = vpop.permute.xlu0 %1224 }
  0xf8   :  { %4464 = vst [vmem:[#allocation68_spill] sm:$0xff] %v3401_v8  ;;  %1412 = vperm.xlu2 %1822, %v2967_v48   ;;  %v613_v56 = vpop.f32.mrf.mxu0  ;;  %710 = vmatmul.bf16.gmra.mxu2 %v164_v2  ;;  %v4467_v48 = vld [vmem:[#allocation17_spill] sm:$0xff] }
  0xf9   :  { %v3409_v28 = vadd.f32 %v613_v56, %v418_v41  ;;  %661 = vmatmul.bf16.gmra.mxu1 %v2543_v15  ;;  %759 = vmatmul.bf16.gmra.mxu3 %v164_v2  ;;  %v137_v16 = vunpack.c.l.bf16 %v4467_v48  ;;  %v4471_v15 = vsel %vm2633_vm2, %v2709_v47, %v2813_v1  ;;  %v4473_v41 = vsel %vm2637_vm3, %v2709_v47, %v2813_v1  ;;  %v1832_v48 = vld [vmem:[%s4234_s2 + $0x38] sm:$0xff] }
  0xfa   :  { %808 = vmatmul.bf16.gmra.mxu0 %v164_v2 }
  0xfb   :  { %4465 = vst [vmem:[#allocation69_spill] sm:$0xff] %v3409_v28  ;;  %v3412_v27 = vpop.f32.mrf.mxu2 }
  0xfc   :  { %v1169_v42 = vpop.permute.xlu1 %1168 }
  0xfd   :  { %v3414_v31 = vpop.f32.mrf.mxu3  ;;  %v3425_v9 = vsel %vm2860_vm5, %v1169_v42, %v4469_v19  ;;  %v3434_v2 = vsel %vm2864_vm6, %v1169_v42, %v4471_v15  ;;  %v3443_v56 = vsel %vm2868_vm7, %v1169_v42, %v4473_v41  ;;  %v1833_v19 = vld [vmem:[%s4234_s2 + $0x30] sm:$0xff]  ;;  %v4477_v42 = vld [vmem:[#allocation9_spill] sm:$0xff] }
  0xfe   :  { %4466 = vst [vmem:[#allocation70_spill] sm:$0xff] %v3414_v31  ;;  %v3448_v55 = vpop.permute.xlu2 %1252  ;;  %1420 = vperm.xlu1 %1821, %v1833_v19   ;;  %v153_v41 = vsub.f32 %v4477_v42, %v137_v16  ;;  %v1834_v19 = vld [vmem:[%s4234_s2 + $0x50] sm:$0xff]  ;;  %v1835_v16 = vld [vmem:[%s4234_s2 + $0x48] sm:$0xff] }
  0xff   :  { %4470 = vst [vmem:[#allocation17_spill] sm:$0xff] %v3425_v9  ;;  %v420_v15 = vpop.f32.mrf.mxu1  ;;  %v4478_v9 = vld [vmem:[#allocation10_spill] sm:$0xff] }
 0x100   :  { %4472 = vst [vmem:[#allocation18_spill] sm:$0xff] %v3434_v2  ;;  %1424 = vperm.xlu2 %1822, %v1832_v48   ;;  %v3453_v2 = vpop.permute.xlu0 %1244  ;;  %v615_v47 = vpop.f32.mrf.mxu0 }
 0x101   :  { %4474 = vst [vmem:[#allocation71_spill] sm:$0xff] %v3443_v56  ;;  %v3455_v1 = vadd.f32 %v615_v47, %v420_v15  ;;  %v154_v56 = vsub.f32 %v4478_v9, %v138_v33 }
 0x102   :  { %4475 = vst [vmem:[#allocation72_spill] sm:$0xff] %v3448_v55 }
 0x103   :  { %4476 = vst [vmem:[#allocation73_spill] sm:$0xff] %v3455_v1  ;;  %v3459_v34 = vpop.f32.mrf.mxu2  ;;  %v165_v36 = vpack.c.bf16 %v154_v56, %v153_v41  ;;  %v4486_v41 = vld [vmem:[#allocation37_spill] sm:$0xff] }
 0x104   :  { %4479 = vst [vmem:[#allocation9_spill] sm:$0xff] %v3459_v34 }
 0x105   :  { %v566_v48 = vpop.f32.mrf.mxu3  ;;  %v3467_v8 = vpop.permute.xlu1 %1228 }
 0x106   :  { %v3462_v21 = vadd.f32 %v566_v48, %v2912_v59  ;;  %v3469_v15 = vpop.permute.xlu2 %1264  ;;  %1432 = vperm.xlu1 %1821, %v1835_v16   ;;  %v139_v48 = vunpack.c.l.bf16 %v4486_v41  ;;  %v1836_v16 = vld [vmem:[%s4234_s2 + $0x68] sm:$0xff]  ;;  %v4647_v12 = vld [vmem:[#allocation17_spill] sm:$0xff] }
 0x107   :  { %4481 = vst [vmem:[#allocation74_spill] sm:$0xff] %v3469_v15  ;;  %v423_v33 = vpop.f32.mrf.mxu1 }
 0x108   :  { %4480 = vst [vmem:[#allocation10_spill] sm:$0xff] %v3462_v21  ;;  %1436 = vperm.xlu2 %1822, %v1834_v19   ;;  %v3474_v9 = vpop.permute.xlu0 %1256  ;;  %v618_v56 = vpop.f32.mrf.mxu0  ;;  %715 = vmatmul.bf16.gmra.mxu2 %v165_v36  ;;  %v4487_v19 = vld [vmem:[#allocation38_spill] sm:$0xff] }
 0x109   :  { %4482 = vst [vmem:[#allocation75_spill] sm:$0xff] %v3474_v9  ;;  %v3476_v59 = vadd.f32 %v618_v56, %v423_v33  ;;  %666 = vmatmul.bf16.gmra.mxu1 %v2620_v30  ;;  %764 = vmatmul.bf16.gmra.mxu3 %v165_v36  ;;  %v140_v15 = vunpack.c.l.bf16 %v4487_v19  ;;  %v1837_v30 = vld [vmem:[%s4234_s2 + $0x60] sm:$0xff]  ;;  %v4491_v19 = vld [vmem:[#allocation29_spill] sm:$0xff] }
 0x10a   :  { %813 = vmatmul.bf16.gmra.mxu0 %v165_v36  ;;  %v155_v17 = vsub.f32 %v4491_v19, %v139_v48  ;;  %v4501_v19 = vld [vmem:[#allocation20_spill] sm:$0xff] }
 0x10b   :  { %4483 = vst [vmem:[#allocation76_spill] sm:$0xff] %v3476_v59  ;;  %v3479_v47 = vpop.f32.mrf.mxu2 }
 0x10c   :  { %4484 = vst [vmem:[#allocation77_spill] sm:$0xff] %v3479_v47 }
 0x10d   :  { %v3481_v42 = vpop.f32.mrf.mxu3  ;;  %v3488_v33 = vpop.permute.xlu1 %1236 }
 0x10e   :  { %4485 = vst [vmem:[#allocation78_spill] sm:$0xff] %v3481_v42  ;;  %v3490_v56 = vpop.permute.xlu2 %1276  ;;  %1444 = vperm.xlu1 %1821, %v1837_v30   ;;  %v4492_v42 = vld [vmem:[#allocation30_spill] sm:$0xff]  ;;  %v1838_v30 = vld [vmem:[%s4234_s2 + $0x78] sm:$0xff] }
 0x10f   :  { %4488 = vst [vmem:[#allocation37_spill] sm:$0xff] %v3490_v56  ;;  %v425_v36 = vpop.f32.mrf.mxu1  ;;  %v156_v55 = vsub.f32 %v4492_v42, %v140_v15  ;;  %v4500_v15 = vld [vmem:[#allocation19_spill] sm:$0xff] }
 0x110   :  { %1448 = vperm.xlu2 %1822, %v1836_v16   ;;  %v3495_v20 = vpop.permute.xlu0 %1268  ;;  %v620_v41 = vpop.f32.mrf.mxu0  ;;  %v141_v42 = vunpack.c.l.bf16 %v4500_v15 }
 0x111   :  { %4489 = vst [vmem:[#allocation38_spill] sm:$0xff] %v3495_v20  ;;  %v3497_v59 = vadd.f32 %v620_v41, %v425_v36  ;;  %v166_v56 = vpack.c.bf16 %v156_v55, %v155_v17 }
 0x113   :  { %4490 = vst [vmem:[#allocation79_spill] sm:$0xff] %v3497_v59  ;;  %v3501_v16 = vpop.f32.mrf.mxu2 }
 0x114   :  { %4493 = vst [vmem:[#allocation29_spill] sm:$0xff] %v3501_v16 }
 0x115   :  { %v3503_v47 = vpop.f32.mrf.mxu3  ;;  %v3505_v1 = vpop.permute.xlu1 %1248 }
 0x116   :  { %4494 = vst [vmem:[#allocation30_spill] sm:$0xff] %v3503_v47  ;;  %1456 = vperm.xlu1 %1821, %v1838_v30   ;;  %v3510_v10 = vpop.permute.xlu2 %1288  ;;  %v142_v30 = vunpack.c.l.bf16 %v4501_v19 }
 0x117   :  { %4495 = vst [vmem:[#allocation80_spill] sm:$0xff] %v3505_v1  ;;  %v428_v21 = vpop.f32.mrf.mxu1  ;;  %v4518_v1 = vld [vmem:[#allocation32_spill] sm:$0xff] }
 0x118   :  { %v623_v36 = vpop.f32.mrf.mxu0  ;;  %v3512_v41 = vpop.permute.xlu0 %1280  ;;  %720 = vmatmul.bf16.gmra.mxu2 %v166_v56 }
 0x119   :  { %4496 = vst [vmem:[#allocation81_spill] sm:$0xff] %v3512_v41  ;;  %v3514_v48 = vadd.f32 %v623_v36, %v428_v21  ;;  %671 = vmatmul.bf16.gmra.mxu1 %v2682_v26  ;;  %769 = vmatmul.bf16.gmra.mxu3 %v166_v56  ;;  %v4504_v26 = vld [vmem:[#allocation11_spill] sm:$0xff] }
 0x11a   :  { %818 = vmatmul.bf16.gmra.mxu0 %v166_v56  ;;  %v157_v56 = vsub.f32 %v4504_v26, %v141_v42  ;;  %v4517_v26 = vld [vmem:[#allocation31_spill] sm:$0xff] }
 0x11b   :  { %4497 = vst [vmem:[#allocation82_spill] sm:$0xff] %v3514_v48  ;;  %v3517_v17 = vpop.f32.mrf.mxu2 }
 0x11c   :  { %4498 = vst [vmem:[#allocation83_spill] sm:$0xff] %v3517_v17  ;;  %v158_v17 = vsub.f32 %v4505_v63, %v142_v30 }
 0x11d   :  { %v3519_v55 = vpop.f32.mrf.mxu3  ;;  %v3523_v59 = vpop.permute.xlu1 %1260 }
 0x11e   :  { %4499 = vst [vmem:[#allocation84_spill] sm:$0xff] %v3519_v55  ;;  %v167_v15 = vpack.c.bf16 %v158_v17, %v157_v56  ;;  %v4511_v56 = vld [vmem:[#allocation21_spill] sm:$0xff]  ;;  %v4514_v17 = vld [vmem:[#allocation40_spill] sm:$0xff] }
 0x11f   :  { %4502 = vst [vmem:[#allocation19_spill] sm:$0xff] %v3523_v59  ;;  %v430_v47 = vpop.f32.mrf.mxu1 }
 0x120   :  { %v625_v21 = vpop.f32.mrf.mxu0  ;;  %v3527_v36 = vpop.permute.xlu0 %1292 }
 0x121   :  { %v3525_v16 = vpop.permute.xlu2 %1300  ;;  %v3529_v48 = vadd.f32 %v625_v21, %v430_v47  ;;  %v144_v47 = vunpack.c.l.bf16 %v4514_v17 }
 0x123   :  { %4503 = vst [vmem:[#allocation20_spill] sm:$0xff] %v3529_v48  ;;  %v3533_v34 = vpop.f32.mrf.mxu2 }
 0x124   :  { %4506 = vst [vmem:[#allocation11_spill] sm:$0xff] %v3533_v34 }
 0x125   :  { %v3535_v55 = vpop.f32.mrf.mxu3  ;;  %v3537_v19 = vpop.permute.xlu1 %1272 }
 0x126   :  { %4507 = vst [vmem:[#allocation12_spill] sm:$0xff] %v3535_v55 }
 0x127   :  { %4508 = vst [vmem:[#allocation85_spill] sm:$0xff] %v3537_v19  ;;  %v433_v28 = vpop.f32.mrf.mxu1 }
 0x128   :  { %v628_v31 = vpop.f32.mrf.mxu0  ;;  %v3549_v42 = vpop.permute.xlu0 %1312  ;;  %725 = vmatmul.bf16.gmra.mxu2 %v167_v15 }
 0x129   :  { %v3539_v25 = vpop.permute.xlu2 %1308  ;;  %4509 = vst [vmem:[#allocation86_spill] sm:$0xff] %v3549_v42  ;;  %v3551_v30 = vadd.f32 %v628_v31, %v433_v28  ;;  %676 = vmatmul.bf16.gmra.mxu1 %v4511_v56  ;;  %774 = vmatmul.bf16.gmra.mxu3 %v167_v15  ;;  %v4513_v31 = vld [vmem:[#allocation39_spill] sm:$0xff]  ;;  %v160_v56 = vsub.f32 %v4518_v1, %v144_v47 }
 0x12a   :  { %823 = vmatmul.bf16.gmra.mxu0 %v167_v15  ;;  %v143_v63 = vunpack.c.l.bf16 %v4513_v31 }
 0x12b   :  { %4510 = vst [vmem:[#allocation87_spill] sm:$0xff] %v3551_v30  ;;  %v3566_v28 = vpop.f32.mrf.mxu2 }
 0x12c   :  { %4512 = vst [vmem:[#allocation21_spill] sm:$0xff] %v3566_v28  ;;  %v159_v42 = vsub.f32 %v4517_v26, %v143_v63  ;;  %v4534_v28 = vld [vmem:[#allocation49_spill] sm:$0xff] }
 0x12d   :  { %v3570_v30 = vpop.f32.mrf.mxu3 }
 0x12e   :  { %4515 = vst [vmem:[#allocation39_spill] sm:$0xff] %v3570_v30  ;;  %v3572_v48 = vpop.permute.xlu1 %1284  ;;  %v168_v17 = vpack.c.bf16 %v160_v56, %v159_v42 }
 0x12f   :  { %v435_v21 = vpop.f32.mrf.mxu1  ;;  %v1349_v47 = vsel %vm2637_vm3, %v3286_v46, %v3572_v48  ;;  %v1348_v41 = vsel %vm2633_vm2, %v3286_v46, %v3572_v48 }
 0x130   :  { %v630_v55 = vpop.f32.mrf.mxu0  ;;  %v3592_v63 = vpop.permute.xlu0 %1324 }
 0x131   :  { %v3574_v34 = vpop.permute.xlu2 %1320  ;;  %v3578_v3 = vadd.f32 %v630_v55, %v435_v21  ;;  %4520 = vst [vmem:[#allocation32_spill] sm:$0xff] %v3592_v63  ;;  %v4526_v55 = vld [vmem:[#allocation6_spill] sm:$0xff] }
 0x132   :  { %4516 = vst [vmem:[#allocation40_spill] sm:$0xff] %v3574_v34 }
 0x133   :  { %4519 = vst [vmem:[#allocation31_spill] sm:$0xff] %v3578_v3  ;;  %v3606_v21 = vpop.f32.mrf.mxu2 }
 0x134   :  { %4521 = vst [vmem:[#allocation88_spill] sm:$0xff] %v3606_v21 }
 0x135   :  { %v3608_v26 = vpop.f32.mrf.mxu3 }
 0x136   :  { %4522 = vst [vmem:[#allocation89_spill] sm:$0xff] %v3608_v26  ;;  %v3610_v15 = vpop.permute.xlu1 %1296 }
 0x137   :  { %v438_v31 = vpop.f32.mrf.mxu1 }
 0x138   :  { %v633_v3 = vpop.f32.mrf.mxu0  ;;  %v3628_v56 = vpop.permute.xlu0 %1336  ;;  %730 = vmatmul.bf16.gmra.mxu2 %v168_v17 }
 0x139   :  { %v3612_v1 = vpop.permute.xlu2 %1332  ;;  %v3614_v30 = vadd.f32 %v633_v3, %v438_v31  ;;  %4525 = vst [vmem:[#allocation92_spill] sm:$0xff] %v3628_v56  ;;  %681 = vmatmul.bf16.gmra.mxu1 %v4526_v55  ;;  %779 = vmatmul.bf16.gmra.mxu3 %v168_v17  ;;  %v1347_v55 = vsel %vm2629_vm1, %v3286_v46, %v3572_v48  ;;  %v4535_v46 = vld [vmem:[#allocation33_spill] sm:$0xff]  ;;  %v4536_v48 = vld [vmem:[#allocation34_spill] sm:$0xff] }
 0x13a   :  { %4523 = vst [vmem:[#allocation90_spill] sm:$0xff] %v3612_v1  ;;  %828 = vmatmul.bf16.gmra.mxu0 %v168_v17 }
 0x13b   :  { %4524 = vst [vmem:[#allocation91_spill] sm:$0xff] %v3614_v30  ;;  %v3643_v42 = vpop.f32.mrf.mxu2 }
 0x13c   :  { %4527 = vst [vmem:[#allocation6_spill] sm:$0xff] %v3643_v42 }
 0x13d   :  { %v3645_v30 = vpop.f32.mrf.mxu3 }
 0x13e   :  { %4528 = vst [vmem:[#allocation93_spill] sm:$0xff] %v3645_v30 }
 0x13f   :  { %v3647_v26 = vpop.permute.xlu1 %1304  ;;  %v440_v3 = vpop.f32.mrf.mxu1 }
 0x140   :  { %v635_v21 = vpop.f32.mrf.mxu0  ;;  %v1397_v19 = vpop.permute.xlu0 %1396 }
 0x141   :  { %v3649_v1 = vpop.permute.xlu2 %1344  ;;  %v3651_v31 = vadd.f32 %v635_v21, %v440_v3 }
 0x142   :  { %4529 = vst [vmem:[#allocation94_spill] sm:$0xff] %v3649_v1  ;;  %v1461_v1 = vsel %vm2868_vm7, %v1397_v19, %v1349_v47  ;;  %v1460_v47 = vsel %vm2864_vm6, %v1397_v19, %v1348_v41 }
 0x143   :  { %4530 = vst [vmem:[#allocation95_spill] sm:$0xff] %v3651_v31  ;;  %v3665_v30 = vpop.f32.mrf.mxu2  ;;  %v4533_v31 = vld [vmem:[#allocation53_spill] sm:$0xff] }
 0x144   :  { %4531 = vst [vmem:[#allocation96_spill] sm:$0xff] %v3665_v30 }
 0x145   :  { %v3667_v42 = vpop.f32.mrf.mxu3 }
 0x146   :  { %4532 = vst [vmem:[#allocation97_spill] sm:$0xff] %v3667_v42 }
 0x147   :  { %v3669_v21 = vpop.permute.xlu1 %1316  ;;  %v647_v3 = vpop.f32.mrf.mxu1 }
 0x148   :  { %v648_v56 = vadd.f32 %v647_v3, %v4533_v31  ;;  %v794_v17 = vpop.f32.mrf.mxu0 }
 0x14a   :  { %v836_v20 = vadd.f32 %v794_v17, %v648_v56  ;;  %v1459_v17 = vsel %vm2860_vm5, %v1397_v19, %v1347_v55 }
 0x14b   :  { %v696_v30 = vpop.f32.mrf.mxu2 }
 0x14c   :  { %v1509_v42 = vmul.f32 %v1461_v1, %v836_v20  ;;  %v834_v31 = vadd.f32 %v696_v30, %v3049_v18 }
 0x14d   :  { %v745_v3 = vpop.f32.mrf.mxu3 }
 0x14e   :  { %v1557_v56 = vadd.f32 %v1509_v42, %v3046_v13  ;;  %v835_v63 = vadd.f32 %v745_v3, %v4534_v28  ;;  %v1507_v59 = vmul.f32 %v1459_v17, %v834_v31  ;;  %v1405_v42 = vpop.permute.xlu2 %1404 }
 0x14f   :  { %v3693_v34 = vpop.permute.xlu1 %1328  ;;  %v649_v9 = vpop.f32.mrf.mxu1 }
 0x150   :  { %1605 = vst [vmem:[%s4238_s4 + $0x10] sm:$0xff] %v1557_v56  ;;  %v1508_v18 = vmul.f32 %v1460_v47, %v835_v63  ;;  %v796_v20 = vpop.f32.mrf.mxu0  ;;  %v1555_v13 = vadd.f32 %v1507_v59, %v4535_v46  ;;  %v1355_v59 = vsel %vm2637_vm3, %v3467_v8, %v3527_v36  ;;  %v1353_v47 = vsel %vm2629_vm1, %v3467_v8, %v3527_v36 }
 0x151   :  { %v1467_v3 = vsel %vm2868_vm7, %v1405_v42, %v1355_v59 }
 0x152   :  { %v1556_v30 = vadd.f32 %v1508_v18, %v4536_v48  ;;  %1603 = vst [vmem:[%s4238_s4] sm:$0xff] %v1555_v13  ;;  %v650_v13 = vadd.f32 %v649_v9, %v3103_v58  ;;  %v4537_v48 = vld [vmem:[#allocation43_spill] sm:$0xff]  ;;  %v1351_v58 = vsel %vm2633_vm2, %v3407_v35, %v3510_v10  ;;  %v1352_v9 = vsel %vm2637_vm3, %v3407_v35, %v3510_v10 }
 0x153   :  { %v698_v41 = vpop.f32.mrf.mxu2 }
 0x154   :  { %1604 = vst [vmem:[%s4238_s4 + $0x8] sm:$0xff] %v1556_v30 }
 0x155   :  { %v747_v19 = vpop.f32.mrf.mxu3 }
 0x157   :  { %v3706_v28 = vpop.permute.xlu1 %1340  ;;  %v652_v1 = vpop.f32.mrf.mxu1 }
 0x158   :  { %v653_v63 = vadd.f32 %v652_v1, %v3176_v54  ;;  %v799_v55 = vpop.f32.mrf.mxu0  ;;  %v1354_v54 = vsel %vm2633_vm2, %v3467_v8, %v3527_v36  ;;  %v1465_v1 = vsel %vm2860_vm5, %v1405_v42, %v1353_v47  ;;  %v837_v36 = vadd.f32 %v698_v41, %v3140_v23 }
 0x159   :  { %v1466_v59 = vsel %vm2864_vm6, %v1405_v42, %v1354_v54  ;;  %v838_v42 = vadd.f32 %v747_v19, %v3051_v43  ;;  %v839_v47 = vadd.f32 %v796_v20, %v650_v13  ;;  %v4539_v54 = vld [vmem:[#allocation42_spill] sm:$0xff] }
 0x15a   :  { %v842_v31 = vadd.f32 %v799_v55, %v653_v63 }
 0x15b   :  { %v701_v17 = vpop.f32.mrf.mxu2 }
 0x15c   :  { %v1515_v56 = vmul.f32 %v1467_v3, %v842_v31  ;;  %v840_v18 = vadd.f32 %v701_v17, %v3220_v60  ;;  %v1350_v60 = vsel %vm2629_vm1, %v3407_v35, %v3510_v10  ;;  %v4538_v3 = vld [vmem:[#allocation41_spill] sm:$0xff] }
 0x15d   :  { %v750_v46 = vpop.f32.mrf.mxu3 }
 0x15e   :  { %v1563_v30 = vadd.f32 %v1515_v56, %v4537_v48  ;;  %v841_v63 = vadd.f32 %v750_v46, %v3142_v6  ;;  %v1513_v55 = vmul.f32 %v1465_v1, %v840_v18 }
 0x15f   :  { %v654_v31 = vpop.f32.mrf.mxu1 }
 0x160   :  { %1611 = vst [vmem:[%s4238_s4 + $0x40] sm:$0xff] %v1563_v30  ;;  %v1514_v6 = vmul.f32 %v1466_v59, %v841_v63  ;;  %v801_v8 = vpop.f32.mrf.mxu0  ;;  %v1561_v56 = vadd.f32 %v1513_v55, %v4538_v3  ;;  %v1401_v17 = vpop.permute.xlu1 %1400  ;;  %v655_v41 = vadd.f32 %v654_v31, %v3242_v39  ;;  %v4540_v63 = vld [vmem:[#allocation2_spill] sm:$0xff]  ;;  %v1361_v39 = vsel %vm2637_vm3, %v3488_v33, %v3525_v16 }
 0x161   :  { %v1462_v46 = vsel %vm2860_vm5, %v1401_v17, %v1350_v60  ;;  %v1463_v48 = vsel %vm2864_vm6, %v1401_v17, %v1351_v58  ;;  %v1464_v23 = vsel %vm2868_vm7, %v1401_v17, %v1352_v9  ;;  %v560_v55 = vadd.f32 %v3315_v5, %v4540_v63  ;;  %v4543_v63 = vld [vmem:[#allocation47_spill] sm:$0xff] }
 0x162   :  { %v1562_v18 = vadd.f32 %v1514_v6, %v4539_v54  ;;  %1609 = vst [vmem:[%s4238_s4 + $0x30] sm:$0xff] %v1561_v56  ;;  %v1510_v43 = vmul.f32 %v1462_v46, %v837_v36  ;;  %v1511_v10 = vmul.f32 %v1463_v48, %v838_v42  ;;  %v1512_v35 = vmul.f32 %v1464_v23, %v839_v47 }
 0x163   :  { %v703_v20 = vpop.f32.mrf.mxu2  ;;  %v1358_v60 = vsel %vm2637_vm3, %v3353_v4, %v3610_v15  ;;  %v845_v58 = vadd.f32 %v801_v8, %v655_v41  ;;  %v1360_v54 = vsel %vm2633_vm2, %v3488_v33, %v3525_v16 }
 0x164   :  { %1610 = vst [vmem:[%s4238_s4 + $0x38] sm:$0xff] %v1562_v18  ;;  %v1558_v19 = vadd.f32 %v1510_v43, %v3101_v50  ;;  %v1559_v13 = vadd.f32 %v1511_v10, %v3116_v32  ;;  %v1560_v1 = vadd.f32 %v1512_v35, %v3125_v11  ;;  %v1356_v50 = vsel %vm2629_vm1, %v3353_v4, %v3610_v15  ;;  %v1413_v11 = vpop.permute.xlu2 %1412  ;;  %v4541_v43 = vld [vmem:[#allocation48_spill] sm:$0xff] }
 0x165   :  { %v752_v30 = vpop.f32.mrf.mxu3  ;;  %v1357_v32 = vsel %vm2633_vm2, %v3353_v4, %v3610_v15  ;;  %v843_v6 = vadd.f32 %v703_v20, %v3284_v29  ;;  %v1473_v15 = vsel %vm2868_vm7, %v1413_v11, %v1361_v39 }
 0x166   :  { %1606 = vst [vmem:[%s4238_s4 + $0x18] sm:$0xff] %v1558_v19  ;;  %v844_v9 = vadd.f32 %v752_v30, %v3234_v52  ;;  %v1359_v52 = vsel %vm2629_vm1, %v3488_v33, %v3525_v16  ;;  %v1417_v16 = vpop.permute.xlu0 %1416 }
 0x167   :  { %v657_v59 = vpop.f32.mrf.mxu1  ;;  %1607 = vst [vmem:[%s4238_s4 + $0x20] sm:$0xff] %v1559_v13  ;;  %v1471_v20 = vsel %vm2860_vm5, %v1413_v11, %v1359_v52  ;;  %v4547_v52 = vld [vmem:[#allocation70_spill] sm:$0xff] }
 0x168   :  { %v658_v5 = vadd.f32 %v657_v59, %v3303_v49  ;;  %v804_v31 = vpop.f32.mrf.mxu0  ;;  %1608 = vst [vmem:[%s4238_s4 + $0x28] sm:$0xff] %v1560_v1  ;;  %v1409_v36 = vpop.permute.xlu1 %1408  ;;  %v1364_v1 = vsel %vm2637_vm3, %v3404_v62, %v3647_v26 }
 0x169   :  { %v1468_v49 = vsel %vm2860_vm5, %v1409_v36, %v1356_v50  ;;  %v1469_v3 = vsel %vm2864_vm6, %v1409_v36, %v1357_v32  ;;  %v1470_v4 = vsel %vm2868_vm7, %v1409_v36, %v1358_v60  ;;  %v1476_v50 = vsel %vm2868_vm7, %v1417_v16, %v1364_v1  ;;  %v4554_v1 = vld [vmem:[#allocation8_spill] sm:$0xff] }
 0x16a   :  { %v848_v42 = vadd.f32 %v804_v31, %v658_v5  ;;  %v1516_v8 = vmul.f32 %v1468_v49, %v843_v6  ;;  %v1517_v56 = vmul.f32 %v1469_v3, %v844_v9  ;;  %v1518_v17 = vmul.f32 %v1470_v4, %v845_v58 }
 0x16b   :  { %v706_v47 = vpop.f32.mrf.mxu2  ;;  %v1362_v5 = vsel %vm2629_vm1, %v3404_v62, %v3647_v26  ;;  %v1363_v60 = vsel %vm2633_vm2, %v3404_v62, %v3647_v26 }
 0x16c   :  { %v1521_v29 = vmul.f32 %v1473_v15, %v848_v42  ;;  %v1564_v18 = vadd.f32 %v1516_v8, %v3199_v44  ;;  %v1565_v46 = vadd.f32 %v1517_v56, %v3208_v0  ;;  %v846_v48 = vadd.f32 %v706_v47, %v560_v55  ;;  %v4545_v15 = vld [vmem:[#allocation55_spill] sm:$0xff] }
 0x16d   :  { %v755_v23 = vpop.f32.mrf.mxu3  ;;  %v1566_v35 = vadd.f32 %v1518_v17, %v3217_v40  ;;  %v1472_v44 = vsel %vm2864_vm6, %v1413_v11, %v1360_v54  ;;  %v1474_v6 = vsel %vm2860_vm5, %v1417_v16, %v1362_v5  ;;  %v1475_v42 = vsel %vm2864_vm6, %v1417_v16, %v1363_v60  ;;  %v4546_v17 = vld [vmem:[#allocation5_spill] sm:$0xff] }
 0x16e   :  { %v1569_v10 = vadd.f32 %v1521_v29, %v4541_v43  ;;  %v847_v41 = vadd.f32 %v755_v23, %v3300_v22  ;;  %1612 = vst [vmem:[%s4238_s4 + $0x48] sm:$0xff] %v1564_v18  ;;  %v1519_v33 = vmul.f32 %v1471_v20, %v846_v48  ;;  %v4542_v22 = vld [vmem:[#allocation44_spill] sm:$0xff]  ;;  %v565_v29 = vadd.f32 %v4547_v52, %v4546_v17  ;;  %v4566_v52 = vld [vmem:[#allocation51_spill] sm:$0xff] }
 0x16f   :  { %v659_v0 = vpop.f32.mrf.mxu1  ;;  %1613 = vst [vmem:[%s4238_s4 + $0x50] sm:$0xff] %v1565_v46  ;;  %v4548_v46 = vld [vmem:[#allocation60_spill] sm:$0xff]  ;;  %v4549_v23 = vsel %vm2629_vm1, %v3453_v2, %v3539_v25 }
 0x170   :  { %1617 = vst [vmem:[%s4238_s4 + $0x70] sm:$0xff] %v1569_v10  ;;  %v1520_v40 = vmul.f32 %v1472_v44, %v847_v41  ;;  %v660_v19 = vadd.f32 %v659_v0, %v3372_v61  ;;  %v806_v13 = vpop.f32.mrf.mxu0  ;;  %v1567_v30 = vadd.f32 %v1519_v33, %v4542_v22  ;;  %v4544_v61 = vld [vmem:[#allocation3_spill] sm:$0xff]  ;;  %v1421_v3 = vpop.permute.xlu1 %1420  ;;  %v4550_v10 = vld [vmem:[#allocation69_spill] sm:$0xff]  ;;  %v4551_v41 = vsel %vm2633_vm2, %v3453_v2, %v3539_v25 }
 0x171   :  { %1614 = vst [vmem:[%s4238_s4 + $0x58] sm:$0xff] %v1566_v35  ;;  %v562_v39 = vadd.f32 %v3374_v7, %v4544_v61  ;;  %v1477_v43 = vsel %vm2860_vm5, %v1421_v3, %v4549_v23  ;;  %v1478_v33 = vsel %vm2864_vm6, %v1421_v3, %v4551_v41  ;;  %v1425_v0 = vpop.permute.xlu2 %1424  ;;  %v4553_v22 = vld [vmem:[#allocation7_spill] sm:$0xff] }
 0x172   :  { %v1568_v55 = vadd.f32 %v1520_v40, %v4543_v63  ;;  %v851_v59 = vadd.f32 %v806_v13, %v660_v19  ;;  %1615 = vst [vmem:[%s4238_s4 + $0x60] sm:$0xff] %v1567_v30  ;;  %v4552_v40 = vld [vmem:[#allocation9_spill] sm:$0xff] }
 0x173   :  { %v708_v11 = vpop.f32.mrf.mxu2 }
 0x174   :  { %1616 = vst [vmem:[%s4238_s4 + $0x68] sm:$0xff] %v1568_v55  ;;  %v1524_v32 = vmul.f32 %v1476_v50, %v851_v59  ;;  %v849_v31 = vadd.f32 %v708_v11, %v562_v39 }
 0x175   :  { %v757_v7 = vpop.f32.mrf.mxu3 }
 0x176   :  { %v1572_v58 = vadd.f32 %v1524_v32, %v3137_v57  ;;  %v850_v9 = vadd.f32 %v757_v7, %v3368_v37  ;;  %v1522_v36 = vmul.f32 %v1474_v6, %v849_v31  ;;  %v1367_v37 = vsel %vm2637_vm3, %v3453_v2, %v3539_v25  ;;  %v4555_v25 = vld [vmem:[#allocation80_spill] sm:$0xff]  ;;  %v4556_v2 = vld [vmem:[#allocation86_spill] sm:$0xff]  ;;  %v4561_v6 = vld [vmem:[#allocation73_spill] sm:$0xff] }
 0x177   :  { %v662_v49 = vpop.f32.mrf.mxu1  ;;  %v4557_v59 = vsel %vm2637_vm3, %v4555_v25, %v4556_v2  ;;  %v4558_v32 = vld [vmem:[#allocation10_spill] sm:$0xff]  ;;  %v4559_v31 = vld [vmem:[#allocation52_spill] sm:$0xff]  ;;  %v4560_v60 = vsel %vm2629_vm1, %v4555_v25, %v4556_v2 }
 0x178   :  { %1620 = vst [vmem:[%s4238_s4 + $0x88] sm:$0xff] %v1572_v58  ;;  %v1523_v4 = vmul.f32 %v1475_v42, %v850_v9  ;;  %v663_v62 = vadd.f32 %v662_v49, %v3412_v27  ;;  %v809_v26 = vpop.f32.mrf.mxu0  ;;  %v1570_v57 = vadd.f32 %v1522_v36, %v3129_v45  ;;  %v1479_v27 = vsel %vm2868_vm7, %v1421_v3, %v1367_v37 }
 0x179   :  { %v1482_v61 = vsel %vm2868_vm7, %v1425_v0, %v4557_v59  ;;  %v1480_v58 = vsel %vm2860_vm5, %v1425_v0, %v4560_v60  ;;  %v4562_v42 = vsel %vm2633_vm2, %v4555_v25, %v4556_v2  ;;  %v4573_v25 = vld [vmem:[#allocation16_spill] sm:$0xff] }
 0x17a   :  { %v1571_v8 = vadd.f32 %v1523_v4, %v4545_v15  ;;  %v854_v56 = vadd.f32 %v809_v26, %v663_v62  ;;  %1618 = vst [vmem:[%s4238_s4 + $0x78] sm:$0xff] %v1570_v57  ;;  %v1481_v49 = vsel %vm2864_vm6, %v1425_v0, %v4562_v42  ;;  %v1429_v4 = vpop.permute.xlu0 %1428  ;;  %v4563_v26 = vld [vmem:[#allocation77_spill] sm:$0xff]  ;;  %v4564_v15 = vld [vmem:[#allocation50_spill] sm:$0xff] }
 0x17b   :  { %v711_v47 = vpop.f32.mrf.mxu2 }
 0x17c   :  { %1619 = vst [vmem:[%s4238_s4 + $0x80] sm:$0xff] %v1571_v8  ;;  %v1527_v45 = vmul.f32 %v1479_v27, %v854_v56  ;;  %v852_v54 = vadd.f32 %v711_v47, %v565_v29  ;;  %v4565_v56 = vld [vmem:[#allocation72_spill] sm:$0xff]  ;;  %v4568_v47 = vld [vmem:[#allocation78_spill] sm:$0xff] }
 0x17d   :  { %v760_v18 = vpop.f32.mrf.mxu3  ;;  %v1373_v17 = vsel %vm2637_vm3, %v4565_v56, %v3669_v21  ;;  %v1371_v23 = vsel %vm2629_vm1, %v4565_v56, %v3669_v21 }
 0x17e   :  { %v1575_v48 = vadd.f32 %v1527_v45, %v4548_v46  ;;  %v853_v35 = vadd.f32 %v760_v18, %v4550_v10  ;;  %v1525_v20 = vmul.f32 %v1477_v43, %v852_v54  ;;  %v4567_v45 = vld [vmem:[#allocation22_spill] sm:$0xff]  ;;  %v1485_v18 = vsel %vm2868_vm7, %v1429_v4, %v1373_v17 }
 0x17f   :  { %v664_v44 = vpop.f32.mrf.mxu1  ;;  %v570_v54 = vadd.f32 %v4568_v47, %v4567_v45  ;;  %v4585_v45 = vld [vmem:[#allocation36_spill] sm:$0xff] }
 0x180   :  { %1623 = vst [vmem:[%s4238_s4 + $0xa0] sm:$0xff] %v1575_v48  ;;  %v1526_v16 = vmul.f32 %v1478_v33, %v853_v35  ;;  %v665_v19 = vadd.f32 %v664_v44, %v4552_v40  ;;  %v811_v13 = vpop.f32.mrf.mxu0  ;;  %v1573_v30 = vadd.f32 %v1525_v20, %v4553_v22  ;;  %v1372_v35 = vsel %vm2633_vm2, %v4565_v56, %v3669_v21  ;;  %v4569_v20 = vld [vmem:[#allocation59_spill] sm:$0xff]  ;;  %v4570_v44 = vld [vmem:[#allocation76_spill] sm:$0xff] }
 0x181   :  { %v1483_v33 = vsel %vm2860_vm5, %v1429_v4, %v1371_v23  ;;  %v1484_v40 = vsel %vm2864_vm6, %v1429_v4, %v1372_v35  ;;  %v4583_v56 = vld [vmem:[#allocation83_spill] sm:$0xff] }
 0x182   :  { %v1574_v63 = vadd.f32 %v1526_v16, %v4554_v1  ;;  %v857_v55 = vadd.f32 %v811_v13, %v665_v19  ;;  %1621 = vst [vmem:[%s4238_s4 + $0x90] sm:$0xff] %v1573_v30  ;;  %v1433_v13 = vpop.permute.xlu1 %1432  ;;  %v4571_v30 = vld [vmem:[#allocation29_spill] sm:$0xff]  ;;  %v4588_v23 = vld [vmem:[#allocation19_spill] sm:$0xff] }
 0x183   :  { %v713_v50 = vpop.f32.mrf.mxu2 }
 0x184   :  { %1622 = vst [vmem:[%s4238_s4 + $0x98] sm:$0xff] %v1574_v63  ;;  %v1530_v39 = vmul.f32 %v1482_v61, %v857_v55  ;;  %v855_v11 = vadd.f32 %v713_v50, %v4558_v32  ;;  %v4572_v63 = vld [vmem:[#allocation15_spill] sm:$0xff]  ;;  %v4574_v61 = vld [vmem:[#allocation4_spill] sm:$0xff] }
 0x185   :  { %v762_v5 = vpop.f32.mrf.mxu3  ;;  %v4576_v32 = vld [vmem:[#allocation75_spill] sm:$0xff] }
 0x186   :  { %v1578_v7 = vadd.f32 %v1530_v39, %v4559_v31  ;;  %v856_v9 = vadd.f32 %v762_v5, %v4561_v6  ;;  %v1528_v36 = vmul.f32 %v1480_v58, %v855_v11  ;;  %v4575_v39 = vld [vmem:[#allocation30_spill] sm:$0xff]  ;;  %v4577_v11 = vld [vmem:[#allocation40_spill] sm:$0xff] }
 0x187   :  { %v667_v3 = vpop.f32.mrf.mxu1  ;;  %v572_v50 = vadd.f32 %v4575_v39, %v4574_v61  ;;  %v4578_v5 = vsel %vm2637_vm3, %v4576_v32, %v4577_v11  ;;  %v4580_v42 = vsel %vm2629_vm1, %v4576_v32, %v4577_v11  ;;  %v4596_v39 = vld [vmem:[#allocation25_spill] sm:$0xff] }
 0x188   :  { %1626 = vst [vmem:[%s4238_s4 + $0xb8] sm:$0xff] %v1578_v7  ;;  %v1529_v62 = vmul.f32 %v1481_v49, %v856_v9  ;;  %v668_v57 = vadd.f32 %v667_v3, %v4563_v26  ;;  %v814_v37 = vpop.f32.mrf.mxu0  ;;  %v1576_v8 = vadd.f32 %v1528_v36, %v4564_v15  ;;  %v1488_v31 = vsel %vm2868_vm7, %v1433_v13, %v4578_v5  ;;  %v4579_v9 = vld [vmem:[#allocation64_spill] sm:$0xff]  ;;  %v4581_v3 = vld [vmem:[#allocation79_spill] sm:$0xff]  ;;  %v1437_v15 = vpop.permute.xlu2 %1436  ;;  %v4598_v5 = vld [vmem:[#allocation26_spill] sm:$0xff] }
 0x189   :  { %v1486_v49 = vsel %vm2860_vm5, %v1433_v13, %v4580_v42  ;;  %v4582_v26 = vsel %vm2633_vm2, %v4576_v32, %v4577_v11  ;;  %v4597_v32 = vld [vmem:[#allocation74_spill] sm:$0xff] }
 0x18a   :  { %v1577_v29 = vadd.f32 %v1529_v62, %v4566_v52  ;;  %v860_v27 = vadd.f32 %v814_v37, %v668_v57  ;;  %1624 = vst [vmem:[%s4238_s4 + $0xa8] sm:$0xff] %v1576_v8  ;;  %v1487_v57 = vsel %vm2864_vm6, %v1433_v13, %v4582_v26  ;;  %v4593_v13 = vld [vmem:[#allocation82_spill] sm:$0xff]  ;;  %v1382_v11 = vsel %vm2637_vm3, %v4597_v32, %v3693_v34  ;;  %v4601_v26 = vld [vmem:[#allocation63_spill] sm:$0xff] }
 0x18b   :  { %v716_v48 = vpop.f32.mrf.mxu2 }
 0x18c   :  { %1625 = vst [vmem:[%s4238_s4 + $0xb0] sm:$0xff] %v1577_v29  ;;  %v1533_v46 = vmul.f32 %v1485_v18, %v860_v27  ;;  %v858_v43 = vadd.f32 %v716_v48, %v570_v54  ;;  %v4584_v29 = vld [vmem:[#allocation35_spill] sm:$0xff] }
 0x18d   :  { %v765_v10 = vpop.f32.mrf.mxu3  ;;  %v4586_v18 = vld [vmem:[#allocation23_spill] sm:$0xff] }
 0x18e   :  { %v1581_v41 = vadd.f32 %v1533_v46, %v4569_v20  ;;  %v859_v0 = vadd.f32 %v765_v10, %v4570_v44  ;;  %v1531_v16 = vmul.f32 %v1483_v33, %v858_v43  ;;  %v4587_v46 = vld [vmem:[#allocation84_spill] sm:$0xff] }
 0x18f   :  { %v669_v19 = vpop.f32.mrf.mxu1  ;;  %v575_v48 = vadd.f32 %v4587_v46, %v4586_v18  ;;  %v4589_v43 = vld [vmem:[#allocation32_spill] sm:$0xff]  ;;  %v4605_v46 = vld [vmem:[#allocation62_spill] sm:$0xff] }
 0x190   :  { %1629 = vst [vmem:[%s4238_s4 + $0xd0] sm:$0xff] %v1581_v41  ;;  %v1532_v22 = vmul.f32 %v1484_v40, %v859_v0  ;;  %v670_v21 = vadd.f32 %v669_v19, %v4571_v30  ;;  %v816_v1 = vpop.f32.mrf.mxu0  ;;  %v1579_v55 = vadd.f32 %v1531_v16, %v4572_v63  ;;  %v4590_v10 = vsel %vm2637_vm3, %v4588_v23, %v4589_v43  ;;  %v4591_v0 = vld [vmem:[#allocation54_spill] sm:$0xff] }
 0x191   :  { %v1491_v35 = vsel %vm2868_vm7, %v1437_v15, %v4590_v10  ;;  %v4592_v40 = vsel %vm2629_vm1, %v4588_v23, %v4589_v43  ;;  %v4607_v10 = vld [vmem:[#allocation39_spill] sm:$0xff] }
 0x192   :  { %v1580_v2 = vadd.f32 %v1532_v22, %v4573_v25  ;;  %v863_v59 = vadd.f32 %v816_v1, %v670_v21  ;;  %1627 = vst [vmem:[%s4238_s4 + $0xc0] sm:$0xff] %v1579_v55  ;;  %v1489_v19 = vsel %vm2860_vm5, %v1437_v15, %v4592_v40  ;;  %v4594_v21 = vsel %vm2633_vm2, %v4588_v23, %v4589_v43  ;;  %v1441_v55 = vpop.permute.xlu0 %1440  ;;  %v4606_v43 = vld [vmem:[#allocation13_spill] sm:$0xff] }
 0x193   :  { %v718_v60 = vpop.f32.mrf.mxu2  ;;  %v1490_v1 = vsel %vm2864_vm6, %v1437_v15, %v4594_v21  ;;  %v4602_v15 = vld [vmem:[#allocation20_spill] sm:$0xff] }
 0x194   :  { %1628 = vst [vmem:[%s4238_s4 + $0xc8] sm:$0xff] %v1580_v2  ;;  %v1536_v7 = vmul.f32 %v1488_v31, %v863_v59  ;;  %v861_v58 = vadd.f32 %v718_v60, %v572_v50  ;;  %v4595_v2 = vld [vmem:[#allocation11_spill] sm:$0xff]  ;;  %v4599_v60 = vld [vmem:[#allocation45_spill] sm:$0xff] }
 0x195   :  { %v767_v6 = vpop.f32.mrf.mxu3 }
 0x196   :  { %v1584_v36 = vadd.f32 %v1536_v7, %v4579_v9  ;;  %v862_v4 = vadd.f32 %v767_v6, %v4581_v3  ;;  %v1534_v62 = vmul.f32 %v1486_v49, %v861_v58  ;;  %v4600_v58 = vld [vmem:[#allocation12_spill] sm:$0xff]  ;;  %v1494_v9 = vsel %vm2868_vm7, %v1441_v55, %v1382_v11 }
 0x197   :  { %v672_v37 = vpop.f32.mrf.mxu1  ;;  %v577_v6 = vadd.f32 %v4600_v58, %v4599_v60  ;;  %v1380_v49 = vsel %vm2629_vm1, %v4597_v32, %v3693_v34 }
 0x198   :  { %1632 = vst [vmem:[%s4238_s4 + $0xe8] sm:$0xff] %v1584_v36  ;;  %v1535_v8 = vmul.f32 %v1487_v57, %v862_v4  ;;  %v673_v17 = vadd.f32 %v672_v37, %v4583_v56  ;;  %v819_v52 = vpop.f32.mrf.mxu0  ;;  %v1582_v27 = vadd.f32 %v1534_v62, %v4584_v29  ;;  %v1381_v62 = vsel %vm2633_vm2, %v4597_v32, %v3693_v34  ;;  %v1445_v29 = vpop.permute.xlu1 %1444 }
 0x199   :  { %v1492_v37 = vsel %vm2860_vm5, %v1441_v55, %v1380_v49  ;;  %v4621_v49 = vld [vmem:[#allocation92_spill] sm:$0xff] }
 0x19a   :  { %v1583_v47 = vadd.f32 %v1535_v8, %v4585_v45  ;;  %v866_v54 = vadd.f32 %v819_v52, %v673_v17  ;;  %1630 = vst [vmem:[%s4238_s4 + $0xd8] sm:$0xff] %v1582_v27  ;;  %v1493_v17 = vsel %vm2864_vm6, %v1441_v55, %v1381_v62  ;;  %v4603_v45 = vld [vmem:[#allocation21_spill] sm:$0xff] }
 0x19b   :  { %v721_v41 = vpop.f32.mrf.mxu2 }
 0x19c   :  { %1631 = vst [vmem:[%s4238_s4 + $0xe0] sm:$0xff] %v1583_v47  ;;  %v1539_v20 = vmul.f32 %v1491_v35, %v866_v54  ;;  %v864_v33 = vadd.f32 %v721_v41, %v575_v48  ;;  %v4604_v54 = vld [vmem:[#allocation61_spill] sm:$0xff]  ;;  %v580_v35 = vadd.f32 %v4607_v10, %v4606_v43  ;;  %v4609_v41 = vld [vmem:[#allocation90_spill] sm:$0xff]  ;;  %v4628_v43 = vld [vmem:[#allocation56_spill] sm:$0xff] }
 0x19d   :  { %v770_v44 = vpop.f32.mrf.mxu3 }
 0x19e   :  { %v1587_v16 = vadd.f32 %v1539_v20, %v4591_v0  ;;  %v865_v22 = vadd.f32 %v770_v44, %v4593_v13  ;;  %v1537_v30 = vmul.f32 %v1489_v19, %v864_v33  ;;  %v4608_v20 = vld [vmem:[#allocation38_spill] sm:$0xff]  ;;  %v4611_v13 = vld [vmem:[#allocation68_spill] sm:$0xff] }
 0x19f   :  { %v674_v63 = vpop.f32.mrf.mxu1  ;;  %v4610_v33 = vsel %vm2637_vm3, %v4608_v20, %v4609_v41 }
 0x1a0   :  { %1635 = vst [vmem:[%s4238_s4 + $0x100] sm:$0xff] %v1587_v16  ;;  %v1538_v25 = vmul.f32 %v1490_v1, %v865_v22  ;;  %v675_v59 = vadd.f32 %v674_v63, %v4595_v2  ;;  %v821_v61 = vpop.f32.mrf.mxu0  ;;  %v1585_v50 = vadd.f32 %v1537_v30, %v4596_v39  ;;  %v1497_v44 = vsel %vm2868_vm7, %v1445_v29, %v4610_v33  ;;  %v4613_v1 = vld [vmem:[#allocation87_spill] sm:$0xff] }
 0x1a1   :  { %v4612_v30 = vsel %vm2629_vm1, %v4608_v20, %v4609_v41 }
 0x1a2   :  { %v1586_v31 = vadd.f32 %v1538_v25, %v4598_v5  ;;  %v869_v7 = vadd.f32 %v821_v61, %v675_v59  ;;  %1633 = vst [vmem:[%s4238_s4 + $0xf0] sm:$0xff] %v1585_v50  ;;  %v1495_v21 = vsel %vm2860_vm5, %v1445_v29, %v4612_v30  ;;  %v4614_v25 = vsel %vm2633_vm2, %v4608_v20, %v4609_v41  ;;  %v1449_v61 = vpop.permute.xlu2 %1448  ;;  %v4615_v50 = vld [vmem:[#allocation88_spill] sm:$0xff]  ;;  %v4616_v5 = vld [vmem:[#allocation27_spill] sm:$0xff]  ;;  %v4630_v41 = vld [vmem:[#allocation57_spill] sm:$0xff] }
 0x1a3   :  { %v723_v42 = vpop.f32.mrf.mxu2  ;;  %v1496_v2 = vsel %vm2864_vm6, %v1445_v29, %v4614_v25  ;;  %v4633_v25 = vld [vmem:[#allocation67_spill] sm:$0xff] }
 0x1a4   :  { %1634 = vst [vmem:[%s4238_s4 + $0xf8] sm:$0xff] %v1586_v31  ;;  %v1542_v36 = vmul.f32 %v1494_v9, %v869_v7  ;;  %v867_v3 = vadd.f32 %v723_v42, %v577_v6  ;;  %v4617_v7 = vld [vmem:[#allocation28_spill] sm:$0xff]  ;;  %v4618_v6 = vld [vmem:[#allocation14_spill] sm:$0xff]  ;;  %v4619_v9 = vld [vmem:[#allocation89_spill] sm:$0xff] }
 0x1a5   :  { %v772_v4 = vpop.f32.mrf.mxu3  ;;  %v4620_v42 = vld [vmem:[#allocation85_spill] sm:$0xff] }
 0x1a6   :  { %v1590_v57 = vadd.f32 %v1542_v36, %v4601_v26  ;;  %v868_v8 = vadd.f32 %v772_v4, %v4602_v15  ;;  %v1540_v56 = vmul.f32 %v1492_v37, %v867_v3  ;;  %v582_v36 = vadd.f32 %v4619_v9, %v4618_v6  ;;  %v4637_v6 = vld [vmem:[#allocation66_spill] sm:$0xff] }
 0x1a7   :  { %v677_v52 = vpop.f32.mrf.mxu1  ;;  %v4622_v3 = vsel %vm2637_vm3, %v4620_v42, %v4621_v49  ;;  %v4623_v15 = vsel %vm2629_vm1, %v4620_v42, %v4621_v49 }
 0x1a8   :  { %1638 = vst [vmem:[%s4238_s4 + $0x118] sm:$0xff] %v1590_v57  ;;  %v1541_v27 = vmul.f32 %v1493_v17, %v868_v8  ;;  %v678_v34 = vadd.f32 %v677_v52, %v4603_v45  ;;  %v824_v47 = vpop.f32.mrf.mxu0  ;;  %v1588_v18 = vadd.f32 %v1540_v56, %v4604_v54  ;;  %v1500_v4 = vsel %vm2868_vm7, %v1449_v61, %v4622_v3  ;;  %v4624_v56 = vld [vmem:[#allocation58_spill] sm:$0xff]  ;;  %v4625_v52 = vld [vmem:[#allocation31_spill] sm:$0xff]  ;;  %v1453_v54 = vpop.permute.xlu0 %1452 }
 0x1a9   :  { %v1498_v8 = vsel %vm2860_vm5, %v1449_v61, %v4623_v15 }
 0x1aa   :  { %v1589_v48 = vadd.f32 %v1541_v27, %v4605_v46  ;;  %v872_v23 = vadd.f32 %v824_v47, %v678_v34  ;;  %1636 = vst [vmem:[%s4238_s4 + $0x108] sm:$0xff] %v1588_v18  ;;  %v4626_v27 = vsel %vm2633_vm2, %v4620_v42, %v4621_v49  ;;  %v4627_v46 = vld [vmem:[#allocation6_spill] sm:$0xff]  ;;  %v4639_v49 = vld [vmem:[#allocation97_spill] sm:$0xff] }
 0x1ab   :  { %v726_v16 = vpop.f32.mrf.mxu2  ;;  %v1499_v45 = vsel %vm2864_vm6, %v1449_v61, %v4626_v27  ;;  %v4638_v42 = vld [vmem:[#allocation46_spill] sm:$0xff] }
 0x1ac   :  { %1637 = vst [vmem:[%s4238_s4 + $0x110] sm:$0xff] %v1589_v48  ;;  %v1545_v0 = vmul.f32 %v1497_v44, %v872_v23  ;;  %v870_v40 = vadd.f32 %v726_v16, %v580_v35  ;;  %v4629_v35 = vld [vmem:[#allocation37_spill] sm:$0xff]  ;;  %v587_v3 = vadd.f32 %v4639_v49, %v4638_v42 }
 0x1ad   :  { %v775_v19 = vpop.f32.mrf.mxu3  ;;  %v1391_v20 = vsel %vm2637_vm3, %v4629_v35, %v3706_v28  ;;  %v4632_v16 = vld [vmem:[#allocation93_spill] sm:$0xff]  ;;  %v1389_v30 = vsel %vm2629_vm1, %v4629_v35, %v3706_v28 }
 0x1ae   :  { %v1593_v22 = vadd.f32 %v1545_v0, %v4611_v13  ;;  %v871_v63 = vadd.f32 %v775_v19, %v4613_v1  ;;  %v1543_v55 = vmul.f32 %v1495_v21, %v870_v40  ;;  %v4631_v0 = vld [vmem:[#allocation24_spill] sm:$0xff]  ;;  %v1503_v19 = vsel %vm2868_vm7, %v1453_v54, %v1391_v20 }
 0x1af   :  { %v679_v59 = vpop.f32.mrf.mxu1  ;;  %v585_v40 = vadd.f32 %v4632_v16, %v4631_v0 }
 0x1b0   :  { %1641 = vst [vmem:[%s4238_s4 + $0x130] sm:$0xff] %v1593_v22  ;;  %v1544_v39 = vmul.f32 %v1496_v2, %v871_v63  ;;  %v680_v32 = vadd.f32 %v679_v59, %v4615_v50  ;;  %v826_v11 = vpop.f32.mrf.mxu0  ;;  %v1591_v31 = vadd.f32 %v1543_v55, %v4616_v5  ;;  %v1390_v63 = vsel %vm2633_vm2, %v4629_v35, %v3706_v28  ;;  %v4634_v59 = vld [vmem:[#allocation91_spill] sm:$0xff] }
 0x1b1   :  { %v1501_v55 = vsel %vm2860_vm5, %v1453_v54, %v1389_v30 }
 0x1b2   :  { %v1592_v60 = vadd.f32 %v1544_v39, %v4617_v7  ;;  %v875_v58 = vadd.f32 %v826_v11, %v680_v32  ;;  %1639 = vst [vmem:[%s4238_s4 + $0x120] sm:$0xff] %v1591_v31  ;;  %v1502_v39 = vsel %vm2864_vm6, %v1453_v54, %v1390_v63  ;;  %v1457_v11 = vpop.permute.xlu1 %1456  ;;  %v4635_v31 = vld [vmem:[#allocation96_spill] sm:$0xff]  ;;  %v4636_v7 = vld [vmem:[#allocation65_spill] sm:$0xff] }
 0x1b3   :  { %v728_v26 = vpop.f32.mrf.mxu2 }
 0x1b4   :  { %1640 = vst [vmem:[%s4238_s4 + $0x128] sm:$0xff] %v1592_v60  ;;  %v1548_v62 = vmul.f32 %v1500_v4, %v875_v58  ;;  %v873_v57 = vadd.f32 %v728_v26, %v582_v36  ;;  %v4640_v4 = vld [vmem:[#allocation81_spill] sm:$0xff] }
 0x1b5   :  { %v777_v37 = vpop.f32.mrf.mxu3 }
 0x1b6   :  { %v1596_v17 = vadd.f32 %v1548_v62, %v4624_v56  ;;  %v874_v29 = vadd.f32 %v777_v37, %v4625_v52  ;;  %v1546_v34 = vmul.f32 %v1498_v8, %v873_v57  ;;  %v4641_v62 = vld [vmem:[#allocation94_spill] sm:$0xff] }
 0x1b7   :  { %v682_v47 = vpop.f32.mrf.mxu1  ;;  %v4642_v26 = vsel %vm2637_vm3, %v4640_v4, %v4641_v62  ;;  %v4643_v24 = vsel %vm2629_vm1, %v4640_v4, %v4641_v62 }
 0x1b8   :  { %1644 = vst [vmem:[%s4238_s4 + $0x148] sm:$0xff] %v1596_v17  ;;  %v1547_v18 = vmul.f32 %v1499_v45, %v874_v29  ;;  %v683_v48 = vadd.f32 %v682_v47, %v4627_v46  ;;  %v829_v23 = vpop.f32.mrf.mxu0  ;;  %v1594_v10 = vadd.f32 %v1546_v34, %v4628_v43  ;;  %v1506_v57 = vsel %vm2868_vm7, %v1457_v11, %v4642_v26  ;;  %v4644_v17 = vld [vmem:[#allocation71_spill] sm:$0xff] }
 0x1b9   :  { %v1504_v38 = vsel %vm2860_vm5, %v1457_v11, %v4643_v24  ;;  %v4645_v29 = vld [vmem:[#allocation95_spill] sm:$0xff]  ;;  %v4646_v45 = vsel %vm2633_vm2, %v4640_v4, %v4641_v62 }
 0x1ba   :  { %v1595_v33 = vadd.f32 %v1547_v18, %v4630_v41  ;;  %v878_v44 = vadd.f32 %v829_v23, %v683_v48  ;;  %1642 = vst [vmem:[%s4238_s4 + $0x138] sm:$0xff] %v1594_v10  ;;  %v1505_v34 = vsel %vm2864_vm6, %v1457_v11, %v4646_v45  ;;  %v4648_v18 = vld [vmem:[#allocation18_spill] sm:$0xff] }
 0x1bb   :  { %v731_v22 = vpop.f32.mrf.mxu2 }
 0x1bc   :  { %1643 = vst [vmem:[%s4238_s4 + $0x140] sm:$0xff] %v1595_v33  ;;  %v1551_v13 = vmul.f32 %v1503_v19, %v878_v44  ;;  %v876_v21 = vadd.f32 %v731_v22, %v585_v40 }
 0x1bd   :  { %v780_v1 = vpop.f32.mrf.mxu3 }
 0x1be   :  { %v1599_v2 = vadd.f32 %v1551_v13, %v4633_v25  ;;  %v877_v61 = vadd.f32 %v780_v1, %v4634_v59  ;;  %v1549_v50 = vmul.f32 %v1501_v55, %v876_v21 }
 0x1bf   :  { %v684_v32 = vpop.f32.mrf.mxu1 }
 0x1c0   :  { %1647 = vst [vmem:[%s4238_s4 + $0x160] sm:$0xff] %v1599_v2  ;;  %v1550_v5 = vmul.f32 %v1502_v39, %v877_v61  ;;  %v685_v28 = vadd.f32 %v684_v32, %v4635_v31  ;;  %v1597_v60 = vadd.f32 %v1549_v50, %v4636_v7  ;;  %v831_v58 = vpop.f32.mrf.mxu0 }
 0x1c2   :  { %v1598_v9 = vadd.f32 %v1550_v5, %v4637_v6  ;;  %v881_v36 = vadd.f32 %v831_v58, %v685_v28  ;;  %1645 = vst [vmem:[%s4238_s4 + $0x150] sm:$0xff] %v1597_v60 }
 0x1c3   :  { %v733_v15 = vpop.f32.mrf.mxu2 }
 0x1c4   :  { %1646 = vst [vmem:[%s4238_s4 + $0x158] sm:$0xff] %v1598_v9  ;;  %v1554_v37 = vmul.f32 %v1506_v57, %v881_v36  ;;  %v879_v8 = vadd.f32 %v733_v15, %v587_v3 }
 0x1c5   :  { %v782_v56 = vpop.f32.mrf.mxu3 }
 0x1c6   :  { %v1602_v52 = vadd.f32 %v1554_v37, %v4644_v17  ;;  %v880_v27 = vadd.f32 %v782_v56, %v4645_v29  ;;  %v1552_v47 = vmul.f32 %v1504_v38, %v879_v8 }
 0x1c8   :  { %1650 = vst [vmem:[%s4238_s4 + $0x178] sm:$0xff] %v1602_v52  ;;  %v1553_v53 = vmul.f32 %v1505_v34, %v880_v27  ;;  %v1600_v54 = vadd.f32 %v1552_v47, %v4647_v12 }
 0x1ca   :  { %v1601_v46 = vadd.f32 %v1553_v53, %v4648_v18  ;;  %1648 = vst [vmem:[%s4238_s4 + $0x168] sm:$0xff] %v1600_v54 }
 0x1cc   :  { %1649 = vst [vmem:[%s4238_s4 + $0x170] sm:$0xff] %v1601_v46 }

</bundles_post_ra>
